<compile_context>
chip_gen: v5e
topology: v5e:2x2
jax: 0.10.0
libtpu: 0.0.40
codegen_flags: <defaults>
</compile_context>

<pallas_src>
import functools

import jax
import jax.numpy as jnp
from jax.experimental import pallas as pl
from jax.experimental.pallas import tpu as pltpu


def _round_up(v, m):
    return (v + m - 1) // m * m


@functools.lru_cache(maxsize=1)
def _vmem_limit_bytes():
    """Generation-aware VMEM budget (don't size every part for v7x)."""
    cap = 64 * 1024 * 1024  # conservative default: v7x has 64 MiB per TensorCore
    try:
        info = pltpu.get_tpu_info()
        cap = int(getattr(info, "vmem_capacity_bytes", cap) or cap)
    except Exception:
        pass
    # ~25% headroom for compiler scratch / double-buffer slack: ~100 MiB on
    # 128 MiB v5e/v6e parts, ~48 MiB on 64 MiB-per-TC v7x.  With megacore
    # ("parallel" dst axis) each TC holds its own resident buffers, so a
    # per-core budget is the right quantity.
    return int(min(cap * 3 // 4, 100 * 1024 * 1024))


def _pick_tile_dst(num_nodes, vmem_limit):
    """Dst-node tile: 128 keeps full MXU output width; bigger tiles amortize the
    ~0.35us per-grid-step overhead on 128 MiB-VMEM parts."""
    if vmem_limit >= 80 * 1024 * 1024:
        if num_nodes >= 2048:
            return 512
        if num_nodes >= 512:
            return 256
    return 128


# ----------------------------- stage 1 kernel ------------------------------
def _xw_kernel(x_ref, w_ref, h_ref):
    """H_tile = x_tile @ [W_root | W_1 | ... | W_R]  (one wide MXU matmul)."""
    h_ref[...] = jnp.dot(
        x_ref[...], w_ref[...], preferred_element_type=jnp.float32
    ).astype(h_ref.dtype)


# ----------------------------- stage 2 kernel ------------------------------
def _agg_kernel(h_ref, hroot_ref, adj_ref, dinv_ref, b_ref, o_ref, acc_ref,
                *, cp, h_resident):
    """Grid step (dst tile i, relation r):
         acc += deg_inv[r, tile] * (count[r, tile, :] @ (x @ W_r))
    with root term + bias folded at r == 0 and ReLU + store at r == R-1."""
    r = pl.program_id(1)

    @pl.when(r == 0)
    def _():
        # root/self term + bias, computed once per dst tile
        acc_ref[...] = hroot_ref[...].astype(jnp.float32) + b_ref[...]

    if h_resident:
        # whole H is VMEM-resident; slice relation r's column block in-kernel
        col0 = pl.multiple_of((r + 1) * cp, cp)
        h_r = h_ref[:, pl.ds(col0, cp)]
    else:
        # streamed fallback: the BlockSpec already delivered relation r's block
        h_r = h_ref[...]

    # int8 {0,1,...} edge counts -> bf16 for the MXU; 1/deg applied in f32 after
    # the accumulation (halves the dominant HBM stream, better accuracy).
    msg = jnp.dot(adj_ref[0].astype(jnp.bfloat16), h_r,
                  preferred_element_type=jnp.float32)
    acc_ref[...] += dinv_ref[0] * msg

    @pl.when(r == pl.num_programs(1) - 1)
    def _():
        # fused ReLU + lane-dense store
        o_ref[...] = jnp.maximum(acc_ref[...], 0.0).astype(o_ref.dtype)


def _stage2_vmem_estimate(np_, cp, cols, tile_dst, resident):
    """Rough stage-2 VMEM bytes (double-buffered inputs/output + f32 scratch)."""
    h = 2 * np_ * (cols if resident else cp) * 2
    hroot = 2 * tile_dst * cp * 2
    adj = 2 * tile_dst * np_ * 1
    dinv = 2 * tile_dst * 4
    bias = 2 * cp * 4
    out = 2 * tile_dst * cp * 2
    acc = tile_dst * cp * 4
    return h + hroot + adj + dinv + bias + out + acc


# ------------------------------ layer wrapper ------------------------------
def rgcn_conv_relu(x, adj, deg_inv, w_all, bias, *, tile_dst, vmem_limit):
    """One RGCNConv layer (mean aggregation) + ReLU.

    x:       (Np, Cp)          bf16 padded node features
    adj:     (R, Np, Np)       int8 edge counts (0/1, k for duplicate edges)
    deg_inv: (R, Np, 1)        f32 1 / max(deg_r(dst), 1)
    w_all:   (Cp, (R+1)*Cp)    bf16 stacked [W_root | W_1 | ... | W_R]
    bias:    (1, Cp)           f32
    returns (Np, Cp) bf16
    """
    np_, cp = x.shape
    num_rel = adj.shape[0]
    cols = w_all.shape[1]
    assert cols == (num_rel + 1) * cp
    n_tiles = np_ // tile_dst

    # ---- stage 1: H = x @ W_all (fuses the R+1 per-relation matmuls) ----
    h = pl.pallas_call(
        _xw_kernel,
        out_shape=jax.ShapeDtypeStruct((np_, cols), jnp.bfloat16),
        grid_spec=pltpu.PrefetchScalarGridSpec(
            num_scalar_prefetch=0,
            grid=(n_tiles,),
            in_specs=[
                pl.BlockSpec((tile_dst, cp), lambda i: (i, 0)),   # x rows tile
                pl.BlockSpec((cp, cols), lambda i: (0, 0)),       # W_all resident
            ],
            out_specs=pl.BlockSpec((tile_dst, cols), lambda i: (i, 0)),
        ),
        compiler_params=pltpu.CompilerParams(
            dimension_semantics=("parallel",),
            vmem_limit_bytes=vmem_limit,
        ),
    )(x, w_all)

    # ---- stage 2: out = relu(H_root + b + sum_r dinv_r * (adj_r @ H_r)) ----
    # Keep the whole H resident in VMEM when it fits: removes the old
    # per-(dst-tile, relation) H re-stream (which matched the adj stream
    # byte-for-byte), leaving the int8 adjacency as the only large HBM stream.
    h_resident = (
        _stage2_vmem_estimate(np_, cp, cols, tile_dst, True) <= int(vmem_limit * 0.85)
    )
    if h_resident:
        h_spec = pl.BlockSpec((np_, cols), lambda i, k: (0, 0))     # resident
    else:
        h_spec = pl.BlockSpec((np_, cp), lambda i, k: (0, k + 1))   # streamed

    # NOTE: on v5e, if the adj DMA is still exposed after tiling,
    # pipeline_mode=pl.Buffered(3) on the adj BlockSpec can hide issue latency
    # (VMEM is plentiful there).
    out = pl.pallas_call(
        functools.partial(_agg_kernel, cp=cp, h_resident=h_resident),
        out_shape=jax.ShapeDtypeStruct((np_, cp), jnp.bfloat16),
        grid_spec=pltpu.PrefetchScalarGridSpec(
            num_scalar_prefetch=0,
            grid=(n_tiles, num_rel),
            in_specs=[
                # message side of H (resident whole-H or streamed per relation)
                h_spec,
                # root side of H: dst-tile rows, column block 0 (x @ W_root);
                # tiny stream (Np*Cp bytes/layer), fetched once per dst tile.
                pl.BlockSpec((tile_dst, cp), lambda i, k: (i, 0)),
                # adjacency tile: relation k, dst tile i, all src columns (int8)
                pl.BlockSpec((1, tile_dst, np_), lambda i, k: (k, i, 0)),
                # per-(relation, dst) inverse degree (f32, applied post-accumulate)
                pl.BlockSpec((1, tile_dst, 1), lambda i, k: (k, i, 0)),
                # bias (resident)
                pl.BlockSpec((1, cp), lambda i, k: (0, 0)),
            ],
            out_specs=pl.BlockSpec((tile_dst, cp), lambda i, k: (i, 0)),
            scratch_shapes=[pltpu.VMEM((tile_dst, cp), jnp.float32)],
        ),
        compiler_params=pltpu.CompilerParams(
            dimension_semantics=("parallel", "arbitrary"),
            vmem_limit_bytes=vmem_limit,
        ),
    )(h, h, adj, deg_inv, bias)
    return out


# ------------------------------- JAX glue ----------------------------------
def build_adjacency(edge_index, edge_type, num_nodes_padded, num_relations):
    """int8 edge-count adjacency + f32 inverse degree (mean aggregation).

    adj[r, dst, src] = #edges(src->dst, type r) (duplicates counted, matching
    the reference); deg_inv[r, dst] = 1/max(deg_r(dst), 1).  The 1/deg scale is
    applied in f32 *after* the MXU accumulation inside the kernel, so adj stays
    1 byte/element and the mean keeps f32 accuracy.
    """
    src, dst = edge_index[0], edge_index[1]
    counts = jnp.zeros(
        (num_relations, num_nodes_padded, num_nodes_padded), jnp.int32)
    counts = counts.at[edge_type, dst, src].add(1)
    deg = counts.sum(axis=-1, keepdims=True)                      # (R, Np, 1)
    deg_inv = 1.0 / jnp.maximum(deg, 1).astype(jnp.float32)
    # TODO(synk): for large graphs, scatter directly into int8 and build deg via
    #             a segment-sum over edges to avoid the int32 R*Np^2 intermediate.
    return counts.astype(jnp.int8), deg_inv


def _pack_weights(w, w_root, bias, cp):
    """Stack + zero-pad weights -> (Cp, (R+1)*Cp) bf16 and (1, Cp) f32 bias."""
    r, c, _ = w.shape
    w_all = jnp.concatenate([w_root[None], w], axis=0)                  # (R+1, C, C)
    w_all_p = jnp.zeros((r + 1, cp, cp), jnp.float32).at[:, :c, :c].set(w_all)
    w_all_p = jnp.transpose(w_all_p, (1, 0, 2)).reshape(cp, (r + 1) * cp)
    bias_p = jnp.zeros((1, cp), jnp.float32).at[0, :c].set(bias)
    # TODO(synk): when C << 128, pack relation columns at C granularity with one
    #             trailing pad to 128 to cut H width from (R+1)*128 lanes.
    return w_all_p.astype(jnp.bfloat16), bias_p


def init_rgcn_params(key, hidden_channels, num_relations):
    k1, k2, k3 = jax.random.split(key, 3)
    scale = 1.0 / jnp.sqrt(jnp.float32(hidden_channels))
    w = jax.random.normal(
        k1, (num_relations, hidden_channels, hidden_channels), jnp.float32) * scale
    w_root = jax.random.normal(
        k2, (hidden_channels, hidden_channels), jnp.float32) * scale
    bias = jax.random.normal(k3, (hidden_channels,), jnp.float32) * 0.01
    return w, w_root, bias


@functools.partial(jax.jit, static_argnames=("num_nodes", "num_relations"))
def rgat_forward(params, x, edge_index, edge_type, edge_attr,
                 *, num_nodes, num_relations):
    # edge_attr is accepted but unused, matching PyG RGCNConv semantics.
    del edge_attr
    n, c = x.shape
    cp = _round_up(c, 128)                           # lane-dense channel padding
    vmem_limit = _vmem_limit_bytes()
    tile_dst = _pick_tile_dst(n, vmem_limit)
    np_ = _round_up(max(n, tile_dst), tile_dst)      # padded node count

    # NOTE: padded dst rows compute relu(bias) and feed layer 2 as padded src
    # rows, but adj columns for padded src nodes are all zero and the final
    # slice drops padded rows, so real outputs are unaffected.
    x_p = jnp.zeros((np_, cp), jnp.bfloat16).at[:n, :c].set(x.astype(jnp.bfloat16))
    adj, deg_inv = build_adjacency(edge_index, edge_type, np_, num_relations)

    (w1, wr1, b1), (w2, wr2, b2) = params
    w_all1, bias1 = _pack_weights(w1, wr1, b1, cp)
    w_all2, bias2 = _pack_weights(w2, wr2, b2, cp)

    h = rgcn_conv_relu(x_p, adj, deg_inv, w_all1, bias1,
                       tile_dst=tile_dst, vmem_limit=vmem_limit)   # conv1 + relu
    h = rgcn_conv_relu(h, adj, deg_inv, w_all2, bias2,
                       tile_dst=tile_dst, vmem_limit=vmem_limit)   # conv2 + relu
    return h[:n, :c].astype(x.dtype)


def rgat_reference(params, x, edge_index, edge_type, num_nodes, num_relations):
    """Pure-JAX f32 reference (for the self-check only)."""
    src, dst = edge_index[0], edge_index[1]
    adj = jnp.zeros((num_relations, num_nodes, num_nodes), jnp.float32)
    adj = adj.at[edge_type, dst, src].add(1.0)
    adj = adj / jnp.maximum(adj.sum(-1, keepdims=True), 1.0)
    h = x
    for (w, w_root, bias) in params:
        out = h @ w_root + bias
        out = out + jnp.einsum("rij,rjk->ik", adj @ h, w)
        h = jax.nn.relu(out)
    return h


if __name__ == "__main__":
    hidden_channels = 32
    num_relations = 4
    num_nodes = 16
    num_edges = 40

    key = jax.random.PRNGKey(0)
    kx, ke_src, ke_dst, ke_typ, ke_attr, kp1, kp2 = jax.random.split(key, 7)

    x = jax.random.normal(kx, (num_nodes, hidden_channels), jnp.float32)
    edge_index = jnp.stack(
        [
            jax.random.randint(ke_src, (num_edges,), 0, num_nodes),
            jax.random.randint(ke_dst, (num_edges,), 0, num_nodes),
        ],
        axis=0,
    )
    edge_type = jax.random.randint(ke_typ, (num_edges,), 0, num_relations)
    edge_attr = jax.random.normal(ke_attr, (num_edges, hidden_channels), jnp.float32)

    params = (
        init_rgcn_params(kp1, hidden_channels, num_relations),  # conv1
        init_rgcn_params(kp2, hidden_channels, num_relations),  # conv2
    )

    out = rgat_forward(params, x, edge_index, edge_type, edge_attr,
                       num_nodes=num_nodes, num_relations=num_relations)
    jax.block_until_ready(out)
    assert out.shape == (num_nodes, hidden_channels)

    ref = rgat_reference(params, x, edge_index, edge_type,
                         num_nodes, num_relations)
    max_err = float(jnp.max(jnp.abs(out - ref)))
    # f32 deg_inv post-scaling makes the kernel much closer to the f32 reference
    # than the old bf16-normalized adjacency; bound by bf16 matmul error.
    tol = max(0.1, 2e-2 * float(jnp.max(jnp.abs(ref))))
    assert max_err < tol, f"kernel mismatch vs reference: max_err={max_err} tol={tol}"
    print("KERNEL_OK")
</pallas_src>

<mosaic_0001>
module attributes {stable_mosaic.version = 11 : i64} {
  func.func @_xw_kernel(%arg0: i32, %arg1: memref<128x128xbf16, #tpu.memory_space<vmem>>, %arg2: memref<128x640xbf16, #tpu.memory_space<vmem>>, %arg3: memref<128x640xbf16, #tpu.memory_space<vmem>>) attributes {dimension_semantics = [#tpu.dimension_semantics<parallel>], iteration_bounds = array<i64: 1>, scalar_prefetch = 0 : i64, scratch_operands = 0 : i64, tpu.core_type = #tpu.core_type<tc>, window_params = [{transform_indices = @transform_0, window_bounds = array<i64: 128, 128>}, {pipeline_mode = #tpu.pipeline_mode<synchronous>, transform_indices = @transform_1, window_bounds = array<i64: 128, 640>}, {transform_indices = @transform_2, window_bounds = array<i64: 128, 640>}]} {
    %c0 = arith.constant 0 : index
    %c0_0 = arith.constant 0 : index
    %0 = vector.load %arg1[%c0, %c0_0] : memref<128x128xbf16, #tpu.memory_space<vmem>>, vector<128x128xbf16>
    %c0_1 = arith.constant 0 : index
    %c0_2 = arith.constant 0 : index
    %1 = vector.load %arg2[%c0_1, %c0_2] : memref<128x640xbf16, #tpu.memory_space<vmem>>, vector<128x640xbf16>
    %cst = arith.constant dense<0.000000e+00> : vector<128x640xf32>
    %2 = tpu.matmul %0, %1, %cst {dimension_numbers = #tpu.dot_dimension_numbers<[1], [0], [0], [1], [0, 0, 1, 1], [], []>} : vector<128x128xbf16>, vector<128x640xbf16>, vector<128x640xf32> -> vector<128x640xf32>
    %3 = arith.truncf %2 : vector<128x640xf32> to vector<128x640xbf16>
    %c0_3 = arith.constant 0 : index
    %c0_4 = arith.constant 0 : index
    %4 = vector.load %arg3[%c0_3, %c0_4] : memref<128x640xbf16, #tpu.memory_space<vmem>>, vector<128x640xbf16>
    tpu.vector_store %arg3[%c0_3, %c0_4], %3 {strides = array<i32>} : memref<128x640xbf16, #tpu.memory_space<vmem>>, vector<128x640xbf16>,
    return
  }
  func.func @transform_0(%arg0: i32) -> (i32, i32) {
    %c0_i32 = arith.constant 0 : i32
    %c0_i32_0 = arith.constant 0 : i32
    return %arg0, %c0_i32 : i32, i32
  }
  func.func @transform_1(%arg0: i32) -> (i32, i32) {
    %c0_i32 = arith.constant 0 : i32
    %c0_i32_0 = arith.constant 0 : i32
    %c0_i32_1 = arith.constant 0 : i32
    return %c0_i32, %c0_i32_0 : i32, i32
  }
  func.func @transform_2(%arg0: i32) -> (i32, i32) {
    %c0_i32 = arith.constant 0 : i32
    %c0_i32_0 = arith.constant 0 : i32
    return %arg0, %c0_i32 : i32, i32
  }
}

module attributes {stable_mosaic.version = 11 : i64} {
  func.func @_agg_kernel(%arg0: i32, %arg1: i32, %arg2: memref<128x640xbf16, #tpu.memory_space<vmem>>, %arg3: memref<128x128xbf16, #tpu.memory_space<vmem>>, %arg4: memref<1x128x128xi8, #tpu.memory_space<vmem>>, %arg5: memref<1x128x1xf32, #tpu.memory_space<vmem>>, %arg6: memref<1x128xf32, #tpu.memory_space<vmem>>, %arg7: memref<128x128xbf16, #tpu.memory_space<vmem>>, %arg8: memref<128x128xf32, #tpu.memory_space<vmem>>) attributes {dimension_semantics = [#tpu.dimension_semantics<parallel>, #tpu.dimension_semantics<arbitrary>], iteration_bounds = array<i64: 1, 4>, scalar_prefetch = 0 : i64, scratch_operands = 1 : i64, tpu.core_type = #tpu.core_type<tc>, window_params = [{pipeline_mode = #tpu.pipeline_mode<synchronous>, transform_indices = @transform_0, window_bounds = array<i64: 128, 640>}, {transform_indices = @transform_1, window_bounds = array<i64: 128, 128>}, {transform_indices = @transform_2, window_bounds = array<i64: 1, 128, 128>}, {transform_indices = @transform_3, window_bounds = array<i64: 1, 128, 1>}, {pipeline_mode = #tpu.pipeline_mode<synchronous>, transform_indices = @transform_4, window_bounds = array<i64: 1, 128>}, {transform_indices = @transform_5, window_bounds = array<i64: 128, 128>}]} {
    %c0_i32 = arith.constant 0 : i32
    %0 = arith.cmpi eq, %arg1, %c0_i32 : i32
    %1 = arith.extui %0 : i1 to i32
    %c0_i32_0 = arith.constant 0 : i32
    %2 = arith.cmpi ne, %1, %c0_i32_0 : i32
    scf.if %2 {
      %c0_12 = arith.constant 0 : index
      %c0_13 = arith.constant 0 : index
      %22 = vector.load %arg3[%c0_12, %c0_13] : memref<128x128xbf16, #tpu.memory_space<vmem>>, vector<128x128xbf16>
      %23 = arith.extf %22 : vector<128x128xbf16> to vector<128x128xf32>
      %c0_14 = arith.constant 0 : index
      %c0_15 = arith.constant 0 : index
      %24 = vector.load %arg6[%c0_14, %c0_15] : memref<1x128xf32, #tpu.memory_space<vmem>>, vector<1x128xf32>
      %25 = vector.broadcast %24 : vector<1x128xf32> to vector<128x128xf32>
      %26 = arith.addf %23, %25 : vector<128x128xf32>
      %c0_16 = arith.constant 0 : index
      %c0_17 = arith.constant 0 : index
      %27 = vector.load %arg8[%c0_16, %c0_17] : memref<128x128xf32, #tpu.memory_space<vmem>>, vector<128x128xf32>
      tpu.vector_store %arg8[%c0_16, %c0_17], %26 {strides = array<i32>} : memref<128x128xf32, #tpu.memory_space<vmem>>, vector<128x128xf32>,
    } else {
    }
    %c1_i32 = arith.constant 1 : i32
    %3 = arith.addi %arg1, %c1_i32 : i32
    %c128_i32 = arith.constant 128 : i32
    %4 = arith.muli %3, %c128_i32 : i32
    %5 = tpu.assume_multiple %4, 128 : i32
    %c0 = arith.constant 0 : index
    %6 = arith.index_cast %5 : i32 to index
    %7 = vector.load %arg2[%c0, %6] : memref<128x640xbf16, #tpu.memory_space<vmem>>, vector<128x128xbf16>
    %c0_1 = arith.constant 0 : index
    %c0_2 = arith.constant 0 : index
    %c0_3 = arith.constant 0 : index
    %8 = vector.load %arg4[%c0_1, %c0_2, %c0_3] : memref<1x128x128xi8, #tpu.memory_space<vmem>>, vector<1x128x128xi8>
    %9 = vector.shape_cast %8 : vector<1x128x128xi8> to vector<128x128xi8>
    %10 = arith.sitofp %9 : vector<128x128xi8> to vector<128x128xbf16>
    %cst = arith.constant dense<0.000000e+00> : vector<128x128xf32>
    %11 = tpu.matmul %10, %7, %cst {dimension_numbers = #tpu.dot_dimension_numbers<[1], [0], [0], [1], [0, 0, 1, 1], [], []>} : vector<128x128xbf16>, vector<128x128xbf16>, vector<128x128xf32> -> vector<128x128xf32>
    %c0_4 = arith.constant 0 : index
    %c0_5 = arith.constant 0 : index
    %12 = vector.load %arg8[%c0_4, %c0_5] : memref<128x128xf32, #tpu.memory_space<vmem>>, vector<128x128xf32>
    %c0_6 = arith.constant 0 : index
    %c0_7 = arith.constant 0 : index
    %c0_8 = arith.constant 0 : index
    %13 = vector.load %arg5[%c0_6, %c0_7, %c0_8] : memref<1x128x1xf32, #tpu.memory_space<vmem>>, vector<1x128x1xf32>
    %14 = vector.shape_cast %13 : vector<1x128x1xf32> to vector<128x1xf32>
    %15 = vector.broadcast %14 : vector<128x1xf32> to vector<128x128xf32>
    %16 = arith.mulf %15, %11 : vector<128x128xf32>
    %17 = arith.addf %12, %16 : vector<128x128xf32>
    %c0_9 = arith.constant 0 : index
    %c0_10 = arith.constant 0 : index
    %18 = vector.load %arg8[%c0_9, %c0_10] : memref<128x128xf32, #tpu.memory_space<vmem>>, vector<128x128xf32>
    tpu.vector_store %arg8[%c0_9, %c0_10], %17 {strides = array<i32>} : memref<128x128xf32, #tpu.memory_space<vmem>>, vector<128x128xf32>,
    %c3_i32 = arith.constant 3 : i32
    %19 = arith.cmpi eq, %arg1, %c3_i32 : i32
    %20 = arith.extui %19 : i1 to i32
    %c0_i32_11 = arith.constant 0 : i32
    %21 = arith.cmpi ne, %20, %c0_i32_11 : i32
    scf.if %21 {
      %c0_12 = arith.constant 0 : index
      %c0_13 = arith.constant 0 : index
      %22 = vector.load %arg8[%c0_12, %c0_13] : memref<128x128xf32, #tpu.memory_space<vmem>>, vector<128x128xf32>
      %cst_14 = arith.constant 0.000000e+00 : f32
      %23 = vector.broadcast %cst_14 : f32 to vector<128x128xf32>
      %24 = arith.maximumf %22, %23 : vector<128x128xf32>
      %25 = arith.truncf %24 : vector<128x128xf32> to vector<128x128xbf16>
      %c0_15 = arith.constant 0 : index
      %c0_16 = arith.constant 0 : index
      %26 = vector.load %arg7[%c0_15, %c0_16] : memref<128x128xbf16, #tpu.memory_space<vmem>>, vector<128x128xbf16>
      tpu.vector_store %arg7[%c0_15, %c0_16], %25 {strides = array<i32>} : memref<128x128xbf16, #tpu.memory_space<vmem>>, vector<128x128xbf16>,
    } else {
    }
    return
  }
  func.func @transform_0(%arg0: i32, %arg1: i32) -> (i32, i32) {
    %c0_i32 = arith.constant 0 : i32
    %c0_i32_0 = arith.constant 0 : i32
    %c0_i32_1 = arith.constant 0 : i32
    return %c0_i32, %c0_i32_0 : i32, i32
  }
  func.func @transform_1(%arg0: i32, %arg1: i32) -> (i32, i32) {
    %c0_i32 = arith.constant 0 : i32
    %c0_i32_0 = arith.constant 0 : i32
    return %arg0, %c0_i32 : i32, i32
  }
  func.func @transform_2(%arg0: i32, %arg1: i32) -> (i32, i32, i32) {
    %c0_i32 = arith.constant 0 : i32
    %c0_i32_0 = arith.constant 0 : i32
    return %arg1, %arg0, %c0_i32 : i32, i32, i32
  }
  func.func @transform_3(%arg0: i32, %arg1: i32) -> (i32, i32, i32) {
    %c0_i32 = arith.constant 0 : i32
    %c0_i32_0 = arith.constant 0 : i32
    return %arg1, %arg0, %c0_i32 : i32, i32, i32
  }
  func.func @transform_4(%arg0: i32, %arg1: i32) -> (i32, i32) {
    %c0_i32 = arith.constant 0 : i32
    %c0_i32_0 = arith.constant 0 : i32
    %c0_i32_1 = arith.constant 0 : i32
    return %c0_i32, %c0_i32_0 : i32, i32
  }
  func.func @transform_5(%arg0: i32, %arg1: i32) -> (i32, i32) {
    %c0_i32 = arith.constant 0 : i32
    %c0_i32_0 = arith.constant 0 : i32
    return %arg0, %c0_i32 : i32, i32
  }
}

</mosaic_0001>

<bundles_post_ra>
// kernel: rgat_forward.4
= control target key start
LH: loop header
LB: loop body
LE: loop exit
PB: predicated region body
PF: predicated region fallthrough
CT: control target
= control target key end

     0   :  { %s1455_s1 = inlined_call_operand.vmem [shape: bf16[128,640], index: 1, kind: input, shape index: {}]   ;;  %s1456_s0 = inlined_call_operand.vmem [shape: bf16[128,128], index: 0, kind: input, shape index: {}]   ;;  %s1457_s2 = inlined_call_operand.vmem [shape: bf16[128,640], index: 2, kind: output, shape index: {}]  }
   0x1   :  { %v850_v0 = vld [vmem:[%s1455_s1 + $0x118] sm:$0xf]  ;;  %v913_v1 = vld [vmem:[%s1455_s1 + $0x128] sm:$0xf0]  ;;  %v830_v2 = vld [vmem:[%s1455_s1 + $0xf0] sm:$0xf] }
   0x2   :  { %v851_v3 = vor.u32 %v913_v1, %v850_v0  ;;  %v908_v4 = vld [vmem:[%s1455_s1 + $0x100] sm:$0xf0]  ;;  %v810_v6 = vld [vmem:[%s1455_s1 + $0xc8] sm:$0xf]  ;;  %v903_v7 = vld [vmem:[%s1455_s1 + $0xd8] sm:$0xf0] }
   0x3   :  { %v831_v5 = vor.u32 %v908_v4, %v830_v2  ;;  %v811_v8 = vor.u32 %v903_v7, %v810_v6  ;;  %v790_v9 = vld [vmem:[%s1455_s1 + $0xa0] sm:$0xf]  ;;  %v898_v10 = vld [vmem:[%s1455_s1 + $0xb0] sm:$0xf0]  ;;  %v770_v12 = vld [vmem:[%s1455_s1 + $0x78] sm:$0xf] }
   0x4   :  { %331 = vmatpush.bf16.msra.mxu0 %v851_v3  ;;  %916 = vmatpush.bf16.msra.mxu1 %v851_v3  ;;  %v791_v11 = vor.u32 %v898_v10, %v790_v9  ;;  %v893_v13 = vld [vmem:[%s1455_s1 + $0x88] sm:$0xf0]  ;;  %v750_v15 = vld [vmem:[%s1455_s1 + $0x50] sm:$0xf]  ;;  %v888_v16 = vld [vmem:[%s1455_s1 + $0x60] sm:$0xf0] }
   0x5   :  { %917 = vmatpush.bf16.msra.mxu2 %v851_v3  ;;  %918 = vmatpush.bf16.msra.mxu3 %v851_v3  ;;  %v771_v14 = vor.u32 %v893_v13, %v770_v12  ;;  %v751_v17 = vor.u32 %v888_v16, %v750_v15  ;;  %v730_v18 = vld [vmem:[%s1455_s1 + $0x28] sm:$0xf]  ;;  %v883_v19 = vld [vmem:[%s1455_s1 + $0x38] sm:$0xf0]  ;;  %v710_v21 = vld [vmem:[%s1455_s1] sm:$0xf] }
   0x6   :  { %v731_v20 = vor.u32 %v883_v19, %v730_v18  ;;  %v878_v22 = vld [vmem:[%s1455_s1 + $0x10] sm:$0xf0]  ;;  %v858_v23 = vld [vmem:[%s1455_s1 + $0x120] sm:$0xf]  ;;  %v912_v25 = vld [vmem:[%s1455_s1 + $0x124] sm:$0xf] }
   0x7   :  { %v914_v24 = vld [vmem:[%s1455_s1 + $0x130] sm:$0xf0]  ;;  %v860_v26 = vld [vmem:[%s1455_s1 + $0x134] sm:$0xf0]  ;;  %v711_v27 = vor.u32 %v878_v22, %v710_v21  ;;  %v1018_v28 = vld [vmem:[%s1456_s0] sm:$0xff] }
   0x8   :  { %332 = vmatpush.bf16.msra.mxu0 %v831_v5  ;;  %919 = vmatpush.bf16.msra.mxu1 %v831_v5  ;;  %v1023_v29 = vld [vmem:[%s1456_s0 + $0x10] sm:$0xff]  ;;  %v911_v30 = vld [vmem:[%s1455_s1 + $0x11c] sm:$0xf]  ;;  %v859_v32 = vor.u32 %v914_v24, %v858_v23  ;;  %v863_v33 = vor.u32 %v912_v25, %v860_v26  ;;  %v866_v34 = vld [vmem:[%s1455_s1 + $0x128] sm:$0xf] }
   0x9   :  { %920 = vmatpush.bf16.msra.mxu2 %v831_v5  ;;  %921 = vmatpush.bf16.msra.mxu3 %v831_v5  ;;  %v852_v31 = vld [vmem:[%s1455_s1 + $0x12c] sm:$0xf0]  ;;  %v915_v35 = vld [vmem:[%s1455_s1 + $0x138] sm:$0xf0]  ;;  %v838_v36 = vld [vmem:[%s1455_s1 + $0xf8] sm:$0xf] }
   0xa   :  { %v909_v37 = vld [vmem:[%s1455_s1 + $0x108] sm:$0xf0]  ;;  %v907_v38 = vld [vmem:[%s1455_s1 + $0xfc] sm:$0xf]  ;;  %v840_v39 = vld [vmem:[%s1455_s1 + $0x10c] sm:$0xf0]  ;;  %v855_v42 = vor.u32 %v911_v30, %v852_v31  ;;  %v867_v43 = vor.u32 %v915_v35, %v866_v34 }
   0xb   :  { %v1052_v40 = vld [vmem:[%s1456_s0 + $0x20] sm:$0xff]  ;;  %v1057_v41 = vld [vmem:[%s1456_s0 + $0x30] sm:$0xff]  ;;  %v832_v45 = vld [vmem:[%s1455_s1 + $0x104] sm:$0xf0]  ;;  %v839_v46 = vor.u32 %v909_v37, %v838_v36  ;;  %v843_v47 = vor.u32 %v907_v38, %v840_v39 }
   0xc   :  { %333 = vmatpush.bf16.msra.mxu0 %v811_v8  ;;  %922 = vmatpush.bf16.msra.mxu1 %v811_v8  ;;  %v906_v44 = vld [vmem:[%s1455_s1 + $0xf4] sm:$0xf]  ;;  %v846_v48 = vld [vmem:[%s1455_s1 + $0x100] sm:$0xf]  ;;  %v818_v50 = vld [vmem:[%s1455_s1 + $0xd0] sm:$0xf] }
   0xd   :  { %923 = vmatpush.bf16.msra.mxu2 %v811_v8  ;;  %924 = vmatpush.bf16.msra.mxu3 %v811_v8  ;;  %v910_v49 = vld [vmem:[%s1455_s1 + $0x110] sm:$0xf0]  ;;  %v904_v51 = vld [vmem:[%s1455_s1 + $0xe0] sm:$0xf0]  ;;  %v820_v53 = vld [vmem:[%s1455_s1 + $0xe4] sm:$0xf0]  ;;  %v835_v54 = vor.u32 %v906_v44, %v832_v45 }
   0xe   :  { %v902_v52 = vld [vmem:[%s1455_s1 + $0xd4] sm:$0xf]  ;;  %v847_v55 = vor.u32 %v910_v49, %v846_v48  ;;  %v901_v56 = vld [vmem:[%s1455_s1 + $0xcc] sm:$0xf]  ;;  %v812_v57 = vld [vmem:[%s1455_s1 + $0xdc] sm:$0xf0]  ;;  %v819_v58 = vor.u32 %v904_v51, %v818_v50 }
   0xf   :  { %v823_v59 = vor.u32 %v902_v52, %v820_v53  ;;  %v826_v60 = vld [vmem:[%s1455_s1 + $0xd8] sm:$0xf]  ;;  %v905_v61 = vld [vmem:[%s1455_s1 + $0xe8] sm:$0xf0]  ;;  %v798_v62 = vld [vmem:[%s1455_s1 + $0xa8] sm:$0xf]  ;;  %v815_v2 = vor.u32 %v901_v56, %v812_v57 }
  0x10   :  { %334 = vmatpush.bf16.msra.mxu0 %v791_v11  ;;  %925 = vmatpush.bf16.msra.mxu1 %v791_v11  ;;  %v899_v63 = vld [vmem:[%s1455_s1 + $0xb8] sm:$0xf0]  ;;  %v897_v0 = vld [vmem:[%s1455_s1 + $0xac] sm:$0xf]  ;;  %v800_v1 = vld [vmem:[%s1455_s1 + $0xbc] sm:$0xf0]  ;;  %v827_v3 = vor.u32 %v905_v61, %v826_v60 }
  0x11   :  { %926 = vmatpush.bf16.msra.mxu2 %v791_v11  ;;  %927 = vmatpush.bf16.msra.mxu3 %v791_v11  ;;  %v896_v4 = vld [vmem:[%s1455_s1 + $0xa4] sm:$0xf]  ;;  %v792_v5 = vld [vmem:[%s1455_s1 + $0xb4] sm:$0xf0]  ;;  %v799_v6 = vor.u32 %v899_v63, %v798_v62  ;;  %v803_v7 = vor.u32 %v897_v0, %v800_v1  ;;  %v806_v8 = vld [vmem:[%s1455_s1 + $0xb0] sm:$0xf] }
  0x12   :  { %v900_v9 = vld [vmem:[%s1455_s1 + $0xc0] sm:$0xf0]  ;;  %v778_v10 = vld [vmem:[%s1455_s1 + $0x80] sm:$0xf]  ;;  %v894_v11 = vld [vmem:[%s1455_s1 + $0x90] sm:$0xf0] }
  0x13   :  { %v892_v12 = vld [vmem:[%s1455_s1 + $0x84] sm:$0xf]  ;;  %v780_v13 = vld [vmem:[%s1455_s1 + $0x94] sm:$0xf0]  ;;  %v807_v15 = vor.u32 %v900_v9, %v806_v8  ;;  %v1138_v16 = vld [vmem:[%s1456_s0 + $0x8] sm:$0xff] }
  0x14   :  { %335 = vmatpush.bf16.msra.mxu0 %v771_v14  ;;  %928 = vmatpush.bf16.msra.mxu1 %v771_v14  ;;  %v891_v18 = vld [vmem:[%s1455_s1 + $0x7c] sm:$0xf]  ;;  %v772_v19 = vld [vmem:[%s1455_s1 + $0x8c] sm:$0xf0]  ;;  %v783_v21 = vor.u32 %v892_v12, %v780_v13  ;;  %v786_v22 = vld [vmem:[%s1455_s1 + $0x88] sm:$0xf] }
  0x15   :  { %929 = vmatpush.bf16.msra.mxu2 %v771_v14  ;;  %930 = vmatpush.bf16.msra.mxu3 %v771_v14  ;;  %v795_v14 = vor.u32 %v896_v4, %v792_v5  ;;  %v895_v23 = vld [vmem:[%s1455_s1 + $0x98] sm:$0xf0]  ;;  %v758_v24 = vld [vmem:[%s1455_s1 + $0x58] sm:$0xf]  ;;  %v889_v25 = vld [vmem:[%s1455_s1 + $0x68] sm:$0xf0] }
  0x16   :  { %v887_v26 = vld [vmem:[%s1455_s1 + $0x5c] sm:$0xf]  ;;  %v1172_v30 = vld [vmem:[%s1456_s0 + $0x28] sm:$0xff]  ;;  %v886_v34 = vld [vmem:[%s1455_s1 + $0x54] sm:$0xf]  ;;  %v759_v36 = vor.u32 %v889_v25, %v758_v24 }
  0x17   :  { %v1177_v31 = vld [vmem:[%s1456_s0 + $0x38] sm:$0xff]  ;;  %v752_v35 = vld [vmem:[%s1455_s1 + $0x64] sm:$0xf0]  ;;  %v766_v38 = vld [vmem:[%s1455_s1 + $0x60] sm:$0xf] }
  0x18   :  { %336 = vmatpush.bf16.msra.mxu0 %v751_v17  ;;  %931 = vmatpush.bf16.msra.mxu1 %v751_v17  ;;  %v890_v39 = vld [vmem:[%s1455_s1 + $0x70] sm:$0xf0]  ;;  %v740_v45 = vld [vmem:[%s1455_s1 + $0x44] sm:$0xf0]  ;;  %v881_v48 = vld [vmem:[%s1455_s1 + $0x2c] sm:$0xf] }
  0x19   :  { %932 = vmatpush.bf16.msra.mxu2 %v751_v17  ;;  %933 = vmatpush.bf16.msra.mxu3 %v751_v17  ;;  %v1143_v17 = vld [vmem:[%s1456_s0 + $0x18] sm:$0xff]  ;;  %v882_v44 = vld [vmem:[%s1455_s1 + $0x34] sm:$0xf]  ;;  %v732_v49 = vld [vmem:[%s1455_s1 + $0x3c] sm:$0xf0] }
  0x1a   :  { %v743_v51 = vor.u32 %v882_v44, %v740_v45  ;;  %v746_v52 = vld [vmem:[%s1455_s1 + $0x38] sm:$0xf]  ;;  %v885_v53 = vld [vmem:[%s1455_s1 + $0x48] sm:$0xf0]  ;;  %v720_v57 = vld [vmem:[%s1455_s1 + $0x1c] sm:$0xf0] }
  0x1b   :  { %v877_v56 = vld [vmem:[%s1455_s1 + $0xc] sm:$0xf]  ;;  %v876_v60 = vld [vmem:[%s1455_s1 + $0x4] sm:$0xf]  ;;  %v712_v63 = vld [vmem:[%s1455_s1 + $0x14] sm:$0xf0] }
  0x1c   :  { %337 = vmatpush.bf16.msra.mxu0 %v731_v20  ;;  %934 = vmatpush.bf16.msra.mxu1 %v731_v20  ;;  %v723_v62 = vor.u32 %v877_v56, %v720_v57  ;;  %v726_v0 = vld [vmem:[%s1455_s1 + $0x10] sm:$0xf]  ;;  %v880_v1 = vld [vmem:[%s1455_s1 + $0x20] sm:$0xf0] }
  0x1d   :  { %935 = vmatpush.bf16.msra.mxu2 %v731_v20  ;;  %936 = vmatpush.bf16.msra.mxu3 %v731_v20  ;;  %v779_v20 = vor.u32 %v894_v11, %v778_v10 }
  0x20   :  { %338 = vmatpush.bf16.msra.mxu0 %v711_v27  ;;  %937 = vmatpush.bf16.msra.mxu1 %v711_v27 }
  0x21   :  { %938 = vmatpush.bf16.msra.mxu2 %v711_v27  ;;  %939 = vmatpush.bf16.msra.mxu3 %v711_v27  ;;  %v760_v27 = vld [vmem:[%s1455_s1 + $0x6c] sm:$0xf0] }
  0x22   :  { %v763_v37 = vor.u32 %v887_v26, %v760_v27 }
  0x23   :  { %339 = vmatmul.bf16.vlgmr.msra.gmra.mxu0 %v1018_v28  ;;  %349 = vmatmul.bf16.vlgmr.msra.gmra.mxu1 %v1023_v29 }
  0x24   :  { %359 = vmatmul.bf16.vlgmr.msra.gmra.mxu2 %v1052_v40  ;;  %369 = vmatmul.bf16.vlgmr.msra.gmra.mxu3 %v1057_v41 }
  0x25   :  { %429 = vmatpush.bf16.msrb.mxu2 %v859_v32  ;;  %478 = vmatpush.bf16.msrb.mxu3 %v863_v33  ;;  %v775_v32 = vor.u32 %v891_v18, %v772_v19  ;;  %v787_v33 = vor.u32 %v895_v23, %v786_v22 }
  0x26   :  { %380 = vmatpush.bf16.msrb.mxu1 %v855_v42  ;;  %527 = vmatpush.bf16.msrb.mxu0 %v867_v43  ;;  %v738_v42 = vld [vmem:[%s1455_s1 + $0x30] sm:$0xf]  ;;  %v884_v43 = vld [vmem:[%s1455_s1 + $0x40] sm:$0xf0] }
  0x27   :  { %v739_v50 = vor.u32 %v884_v43, %v738_v42 }
  0x29   :  { %430 = vmatpush.bf16.msrb.mxu2 %v839_v46  ;;  %479 = vmatpush.bf16.msrb.mxu3 %v843_v47  ;;  %v755_v46 = vor.u32 %v886_v34, %v752_v35  ;;  %v767_v47 = vor.u32 %v890_v39, %v766_v38 }
  0x2a   :  { %381 = vmatpush.bf16.msrb.mxu1 %v835_v54  ;;  %528 = vmatpush.bf16.msrb.mxu0 %v847_v55  ;;  %v718_v54 = vld [vmem:[%s1455_s1 + $0x8] sm:$0xf]  ;;  %v879_v55 = vld [vmem:[%s1455_s1 + $0x18] sm:$0xf0] }
  0x2b   :  { %v719_v61 = vor.u32 %v879_v55, %v718_v54 }
  0x2d   :  { %431 = vmatpush.bf16.msrb.mxu2 %v819_v58  ;;  %480 = vmatpush.bf16.msrb.mxu3 %v823_v59  ;;  %v735_v58 = vor.u32 %v881_v48, %v732_v49  ;;  %v747_v59 = vor.u32 %v885_v53, %v746_v52 }
  0x2e   :  { %382 = vmatpush.bf16.msrb.mxu1 %v815_v2  ;;  %529 = vmatpush.bf16.msrb.mxu0 %v827_v3  ;;  %v715_v2 = vor.u32 %v876_v60, %v712_v63  ;;  %v727_v3 = vor.u32 %v880_v1, %v726_v0 }
  0x31   :  { %432 = vmatpush.bf16.msrb.mxu2 %v799_v6  ;;  %481 = vmatpush.bf16.msrb.mxu3 %v803_v7 }
  0x32   :  { %383 = vmatpush.bf16.msrb.mxu1 %v795_v14  ;;  %530 = vmatpush.bf16.msrb.mxu0 %v807_v15 }
  0x33   :  { %344 = vmatmul.bf16.gmra.mxu0 %v1138_v16  ;;  %354 = vmatmul.bf16.gmra.mxu1 %v1143_v17 }
  0x34   :  { %364 = vmatmul.bf16.gmra.mxu2 %v1172_v30  ;;  %374 = vmatmul.bf16.gmra.mxu3 %v1177_v31 }
  0x35   :  { %433 = vmatpush.bf16.msrb.mxu2 %v779_v20  ;;  %482 = vmatpush.bf16.msrb.mxu3 %v783_v21 }
  0x36   :  { %384 = vmatpush.bf16.msrb.mxu1 %v775_v32  ;;  %531 = vmatpush.bf16.msrb.mxu0 %v787_v33 }
  0x39   :  { %434 = vmatpush.bf16.msrb.mxu2 %v759_v36  ;;  %483 = vmatpush.bf16.msrb.mxu3 %v763_v37 }
  0x3a   :  { %385 = vmatpush.bf16.msrb.mxu1 %v755_v46  ;;  %532 = vmatpush.bf16.msrb.mxu0 %v767_v47 }
  0x3d   :  { %435 = vmatpush.bf16.msrb.mxu2 %v739_v50  ;;  %484 = vmatpush.bf16.msrb.mxu3 %v743_v51 }
  0x3e   :  { %386 = vmatpush.bf16.msrb.mxu1 %v735_v58  ;;  %533 = vmatpush.bf16.msrb.mxu0 %v747_v59 }
  0x41   :  { %436 = vmatpush.bf16.msrb.mxu2 %v719_v61  ;;  %485 = vmatpush.bf16.msrb.mxu3 %v723_v62 }
  0x42   :  { %387 = vmatpush.bf16.msrb.mxu1 %v715_v2  ;;  %534 = vmatpush.bf16.msrb.mxu0 %v727_v3 }
  0x44   :  { %437 = vmatmul.bf16.vlgmr.msrb.gmra.mxu2 %v1018_v28  ;;  %486 = vmatmul.bf16.vlgmr.msrb.gmra.mxu3 %v1018_v28 }
  0x45   :  { %388 = vmatmul.bf16.vlgmr.msrb.gmra.mxu1 %v1018_v28  ;;  %535 = vmatmul.bf16.vlgmr.msrb.gmra.mxu0 %v1018_v28 }
  0x54   :  { %442 = vmatmul.bf16.gmra.mxu2 %v1138_v16  ;;  %491 = vmatmul.bf16.gmra.mxu3 %v1138_v16 }
  0x55   :  { %393 = vmatmul.bf16.gmra.mxu1 %v1138_v16  ;;  %540 = vmatmul.bf16.gmra.mxu0 %v1138_v16 }
  0x64   :  { %447 = vmatmul.bf16.gmra.mxu2 %v1023_v29  ;;  %496 = vmatmul.bf16.gmra.mxu3 %v1023_v29 }
  0x65   :  { %398 = vmatmul.bf16.gmra.mxu1 %v1023_v29  ;;  %545 = vmatmul.bf16.gmra.mxu0 %v1023_v29 }
  0x74   :  { %452 = vmatmul.bf16.gmra.mxu2 %v1143_v17  ;;  %501 = vmatmul.bf16.gmra.mxu3 %v1143_v17 }
  0x75   :  { %403 = vmatmul.bf16.gmra.mxu1 %v1143_v17  ;;  %550 = vmatmul.bf16.gmra.mxu0 %v1143_v17 }
  0x84   :  { %457 = vmatmul.bf16.gmra.mxu2 %v1052_v40  ;;  %506 = vmatmul.bf16.gmra.mxu3 %v1052_v40 }
  0x85   :  { %408 = vmatmul.bf16.gmra.mxu1 %v1052_v40  ;;  %555 = vmatmul.bf16.gmra.mxu0 %v1052_v40 }
  0x94   :  { %462 = vmatmul.bf16.gmra.mxu2 %v1172_v30  ;;  %511 = vmatmul.bf16.gmra.mxu3 %v1172_v30 }
  0x95   :  { %413 = vmatmul.bf16.gmra.mxu1 %v1172_v30  ;;  %560 = vmatmul.bf16.gmra.mxu0 %v1172_v30 }
  0xa0   :  { %v340_v28 = vpop.f32.mrf.mxu0  ;;  %v1267_v29 = vpop.f32.mrf.mxu1 }
  0xa4   :  { %467 = vmatmul.bf16.gmra.mxu2 %v1057_v41  ;;  %516 = vmatmul.bf16.gmra.mxu3 %v1057_v41 }
  0xa5   :  { %418 = vmatmul.bf16.gmra.mxu1 %v1057_v41  ;;  %565 = vmatmul.bf16.gmra.mxu0 %v1057_v41 }
  0xa7   :  { %v1273_v40 = vpop.f32.mrf.mxu2  ;;  %v1275_v4 = vpop.f32.mrf.mxu3 }
  0xa8   :  { %v342_v5 = vpop.f32.mrf.mxu0  ;;  %v1277_v6 = vpop.f32.mrf.mxu1 }
  0xaf   :  { %v1279_v7 = vpop.f32.mrf.mxu2  ;;  %v1281_v8 = vpop.f32.mrf.mxu3 }
  0xb0   :  { %v345_v9 = vpop.f32.mrf.mxu0  ;;  %v1283_v10 = vpop.f32.mrf.mxu1 }
  0xb4   :  { %472 = vmatmul.bf16.gmra.mxu2 %v1177_v31  ;;  %521 = vmatmul.bf16.gmra.mxu3 %v1177_v31 }
  0xb5   :  { %423 = vmatmul.bf16.gmra.mxu1 %v1177_v31  ;;  %570 = vmatmul.bf16.gmra.mxu0 %v1177_v31 }
  0xb7   :  { %v1289_v41 = vpop.f32.mrf.mxu2  ;;  %v1291_v11 = vpop.f32.mrf.mxu3 }
  0xb8   :  { %v347_v12 = vpop.f32.mrf.mxu0  ;;  %v1293_v13 = vpop.f32.mrf.mxu1 }
  0xbf   :  { %v1295_v14 = vpop.f32.mrf.mxu2  ;;  %v1297_v15 = vpop.f32.mrf.mxu3 }
  0xc2   :  { %v389_v16 = vpop.f32.mrf.mxu1  ;;  %v536_v18 = vpop.f32.mrf.mxu0 }
  0xc3   :  { %v576_v17 = vpack.c.bf16 %v389_v16, %v340_v28  ;;  %v578_v19 = vpack.c.bf16 %v536_v18, %v536_v18 }
  0xc5   :  { %624 = vst [vmem:[%s1457_s2] sm:$0xff] %v576_v17 }
  0xc6   :  { %626 = vst [vmem:[%s1457_s2 + $0x10] sm:$0xf] %v578_v19 }
  0xc7   :  { %v438_v20 = vpop.f32.mrf.mxu2  ;;  %v487_v21 = vpop.f32.mrf.mxu3 }
  0xc8   :  { %v577_v22 = vpack.c.bf16 %v487_v21, %v438_v20 }
  0xca   :  { %v391_v23 = vpop.f32.mrf.mxu1  ;;  %v538_v25 = vpop.f32.mrf.mxu0  ;;  %625 = vst [vmem:[%s1457_s2 + $0x8] sm:$0xff] %v577_v22 }
  0xcb   :  { %v579_v24 = vpack.c.bf16 %v391_v23, %v342_v5  ;;  %v581_v26 = vpack.c.bf16 %v538_v25, %v538_v25 }
  0xcd   :  { %627 = vst [vmem:[%s1457_s2 + $0x14] sm:$0xff] %v579_v24 }
  0xce   :  { %629 = vst [vmem:[%s1457_s2 + $0x24] sm:$0xf] %v581_v26 }
  0xcf   :  { %v440_v27 = vpop.f32.mrf.mxu2  ;;  %v489_v30 = vpop.f32.mrf.mxu3 }
  0xd0   :  { %v580_v31 = vpack.c.bf16 %v489_v30, %v440_v27 }
  0xd2   :  { %v394_v32 = vpop.f32.mrf.mxu1  ;;  %v541_v34 = vpop.f32.mrf.mxu0  ;;  %628 = vst [vmem:[%s1457_s2 + $0x1c] sm:$0xff] %v580_v31 }
  0xd3   :  { %v582_v33 = vpack.c.bf16 %v394_v32, %v345_v9  ;;  %v584_v35 = vpack.c.bf16 %v541_v34, %v541_v34 }
  0xd5   :  { %630 = vst [vmem:[%s1457_s2 + $0x28] sm:$0xff] %v582_v33 }
  0xd6   :  { %632 = vst [vmem:[%s1457_s2 + $0x38] sm:$0xf] %v584_v35 }
  0xd7   :  { %v443_v36 = vpop.f32.mrf.mxu2  ;;  %v492_v37 = vpop.f32.mrf.mxu3 }
  0xd8   :  { %v583_v38 = vpack.c.bf16 %v492_v37, %v443_v36 }
  0xda   :  { %v396_v39 = vpop.f32.mrf.mxu1  ;;  %v543_v43 = vpop.f32.mrf.mxu0  ;;  %631 = vst [vmem:[%s1457_s2 + $0x30] sm:$0xff] %v583_v38 }
  0xdb   :  { %v585_v42 = vpack.c.bf16 %v396_v39, %v347_v12  ;;  %v587_v44 = vpack.c.bf16 %v543_v43, %v543_v43 }
  0xdd   :  { %633 = vst [vmem:[%s1457_s2 + $0x3c] sm:$0xff] %v585_v42 }
  0xde   :  { %635 = vst [vmem:[%s1457_s2 + $0x4c] sm:$0xf] %v587_v44 }
  0xdf   :  { %v445_v45 = vpop.f32.mrf.mxu2  ;;  %v494_v46 = vpop.f32.mrf.mxu3 }
  0xe0   :  { %v586_v47 = vpack.c.bf16 %v494_v46, %v445_v45 }
  0xe2   :  { %v399_v48 = vpop.f32.mrf.mxu1  ;;  %v546_v50 = vpop.f32.mrf.mxu0  ;;  %634 = vst [vmem:[%s1457_s2 + $0x44] sm:$0xff] %v586_v47 }
  0xe3   :  { %v588_v49 = vpack.c.bf16 %v399_v48, %v1267_v29  ;;  %v590_v51 = vpack.c.bf16 %v546_v50, %v546_v50 }
  0xe5   :  { %636 = vst [vmem:[%s1457_s2 + $0x50] sm:$0xff] %v588_v49 }
  0xe6   :  { %638 = vst [vmem:[%s1457_s2 + $0x60] sm:$0xf] %v590_v51 }
  0xe7   :  { %v448_v52 = vpop.f32.mrf.mxu2  ;;  %v497_v53 = vpop.f32.mrf.mxu3 }
  0xe8   :  { %v589_v54 = vpack.c.bf16 %v497_v53, %v448_v52 }
  0xea   :  { %v401_v55 = vpop.f32.mrf.mxu1  ;;  %v548_v57 = vpop.f32.mrf.mxu0  ;;  %637 = vst [vmem:[%s1457_s2 + $0x58] sm:$0xff] %v589_v54 }
  0xeb   :  { %v591_v56 = vpack.c.bf16 %v401_v55, %v1277_v6  ;;  %v593_v58 = vpack.c.bf16 %v548_v57, %v548_v57 }
  0xed   :  { %639 = vst [vmem:[%s1457_s2 + $0x64] sm:$0xff] %v591_v56 }
  0xee   :  { %641 = vst [vmem:[%s1457_s2 + $0x74] sm:$0xf] %v593_v58 }
  0xef   :  { %v450_v59 = vpop.f32.mrf.mxu2  ;;  %v499_v60 = vpop.f32.mrf.mxu3 }
  0xf0   :  { %v592_v61 = vpack.c.bf16 %v499_v60, %v450_v59 }
  0xf2   :  { %v404_v62 = vpop.f32.mrf.mxu1  ;;  %v551_v0 = vpop.f32.mrf.mxu0  ;;  %640 = vst [vmem:[%s1457_s2 + $0x6c] sm:$0xff] %v592_v61 }
  0xf3   :  { %v594_v63 = vpack.c.bf16 %v404_v62, %v1283_v10  ;;  %v596_v1 = vpack.c.bf16 %v551_v0, %v551_v0 }
  0xf5   :  { %642 = vst [vmem:[%s1457_s2 + $0x78] sm:$0xff] %v594_v63 }
  0xf6   :  { %644 = vst [vmem:[%s1457_s2 + $0x88] sm:$0xf] %v596_v1 }
  0xf7   :  { %v453_v2 = vpop.f32.mrf.mxu2  ;;  %v502_v3 = vpop.f32.mrf.mxu3 }
  0xf8   :  { %v595_v28 = vpack.c.bf16 %v502_v3, %v453_v2 }
  0xfa   :  { %v406_v29 = vpop.f32.mrf.mxu1  ;;  %v553_v6 = vpop.f32.mrf.mxu0  ;;  %643 = vst [vmem:[%s1457_s2 + $0x80] sm:$0xff] %v595_v28 }
  0xfb   :  { %v597_v5 = vpack.c.bf16 %v406_v29, %v1293_v13  ;;  %v599_v9 = vpack.c.bf16 %v553_v6, %v553_v6 }
  0xfd   :  { %645 = vst [vmem:[%s1457_s2 + $0x8c] sm:$0xff] %v597_v5 }
  0xfe   :  { %647 = vst [vmem:[%s1457_s2 + $0x9c] sm:$0xf] %v599_v9 }
  0xff   :  { %v455_v10 = vpop.f32.mrf.mxu2  ;;  %v504_v12 = vpop.f32.mrf.mxu3 }
 0x100   :  { %v598_v16 = vpack.c.bf16 %v504_v12, %v455_v10 }
 0x102   :  { %v409_v17 = vpop.f32.mrf.mxu1  ;;  %v556_v18 = vpop.f32.mrf.mxu0  ;;  %646 = vst [vmem:[%s1457_s2 + $0x94] sm:$0xff] %v598_v16 }
 0x103   :  { %v600_v13 = vpack.c.bf16 %v409_v17, %v1273_v40  ;;  %v602_v19 = vpack.c.bf16 %v556_v18, %v556_v18 }
 0x105   :  { %648 = vst [vmem:[%s1457_s2 + $0xa0] sm:$0xff] %v600_v13 }
 0x106   :  { %650 = vst [vmem:[%s1457_s2 + $0xb0] sm:$0xf] %v602_v19 }
 0x107   :  { %v458_v20 = vpop.f32.mrf.mxu2  ;;  %v507_v21 = vpop.f32.mrf.mxu3 }
 0x108   :  { %v601_v22 = vpack.c.bf16 %v507_v21, %v458_v20 }
 0x10a   :  { %v411_v23 = vpop.f32.mrf.mxu1  ;;  %v558_v24 = vpop.f32.mrf.mxu0  ;;  %649 = vst [vmem:[%s1457_s2 + $0xa8] sm:$0xff] %v601_v22 }
 0x10b   :  { %v603_v40 = vpack.c.bf16 %v411_v23, %v1279_v7  ;;  %v605_v25 = vpack.c.bf16 %v558_v24, %v558_v24 }
 0x10d   :  { %651 = vst [vmem:[%s1457_s2 + $0xb4] sm:$0xff] %v603_v40 }
 0x10e   :  { %653 = vst [vmem:[%s1457_s2 + $0xc4] sm:$0xf] %v605_v25 }
 0x10f   :  { %v460_v26 = vpop.f32.mrf.mxu2  ;;  %v509_v27 = vpop.f32.mrf.mxu3 }
 0x110   :  { %v604_v30 = vpack.c.bf16 %v509_v27, %v460_v26 }
 0x112   :  { %v414_v31 = vpop.f32.mrf.mxu1  ;;  %v561_v32 = vpop.f32.mrf.mxu0  ;;  %652 = vst [vmem:[%s1457_s2 + $0xbc] sm:$0xff] %v604_v30 }
 0x113   :  { %v606_v7 = vpack.c.bf16 %v414_v31, %v1289_v41  ;;  %v608_v33 = vpack.c.bf16 %v561_v32, %v561_v32 }
 0x115   :  { %654 = vst [vmem:[%s1457_s2 + $0xc8] sm:$0xff] %v606_v7 }
 0x116   :  { %656 = vst [vmem:[%s1457_s2 + $0xd8] sm:$0xf] %v608_v33 }
 0x117   :  { %v463_v34 = vpop.f32.mrf.mxu2  ;;  %v512_v35 = vpop.f32.mrf.mxu3 }
 0x118   :  { %v607_v36 = vpack.c.bf16 %v512_v35, %v463_v34 }
 0x11a   :  { %v416_v37 = vpop.f32.mrf.mxu1  ;;  %v563_v38 = vpop.f32.mrf.mxu0  ;;  %655 = vst [vmem:[%s1457_s2 + $0xd0] sm:$0xff] %v607_v36 }
 0x11b   :  { %v609_v41 = vpack.c.bf16 %v416_v37, %v1295_v14  ;;  %v611_v39 = vpack.c.bf16 %v563_v38, %v563_v38 }
 0x11d   :  { %657 = vst [vmem:[%s1457_s2 + $0xdc] sm:$0xff] %v609_v41 }
 0x11e   :  { %659 = vst [vmem:[%s1457_s2 + $0xec] sm:$0xf] %v611_v39 }
 0x11f   :  { %v465_v42 = vpop.f32.mrf.mxu2  ;;  %v514_v43 = vpop.f32.mrf.mxu3 }
 0x120   :  { %v610_v44 = vpack.c.bf16 %v514_v43, %v465_v42 }
 0x122   :  { %v419_v45 = vpop.f32.mrf.mxu1  ;;  %v566_v46 = vpop.f32.mrf.mxu0  ;;  %658 = vst [vmem:[%s1457_s2 + $0xe4] sm:$0xff] %v610_v44 }
 0x123   :  { %v612_v14 = vpack.c.bf16 %v419_v45, %v1275_v4  ;;  %v614_v47 = vpack.c.bf16 %v566_v46, %v566_v46 }
 0x125   :  { %660 = vst [vmem:[%s1457_s2 + $0xf0] sm:$0xff] %v612_v14 }
 0x126   :  { %662 = vst [vmem:[%s1457_s2 + $0x100] sm:$0xf] %v614_v47 }
 0x127   :  { %v468_v48 = vpop.f32.mrf.mxu2  ;;  %v517_v49 = vpop.f32.mrf.mxu3 }
 0x128   :  { %v613_v50 = vpack.c.bf16 %v517_v49, %v468_v48 }
 0x12a   :  { %v421_v51 = vpop.f32.mrf.mxu1  ;;  %v568_v52 = vpop.f32.mrf.mxu0  ;;  %661 = vst [vmem:[%s1457_s2 + $0xf8] sm:$0xff] %v613_v50 }
 0x12b   :  { %v615_v4 = vpack.c.bf16 %v421_v51, %v1281_v8  ;;  %v617_v53 = vpack.c.bf16 %v568_v52, %v568_v52 }
 0x12d   :  { %663 = vst [vmem:[%s1457_s2 + $0x104] sm:$0xff] %v615_v4 }
 0x12e   :  { %665 = vst [vmem:[%s1457_s2 + $0x114] sm:$0xf] %v617_v53 }
 0x12f   :  { %v470_v54 = vpop.f32.mrf.mxu2  ;;  %v519_v55 = vpop.f32.mrf.mxu3 }
 0x130   :  { %v616_v56 = vpack.c.bf16 %v519_v55, %v470_v54 }
 0x132   :  { %v424_v57 = vpop.f32.mrf.mxu1  ;;  %v571_v58 = vpop.f32.mrf.mxu0  ;;  %664 = vst [vmem:[%s1457_s2 + $0x10c] sm:$0xff] %v616_v56 }
 0x133   :  { %v618_v8 = vpack.c.bf16 %v424_v57, %v1291_v11  ;;  %v620_v59 = vpack.c.bf16 %v571_v58, %v571_v58 }
 0x135   :  { %666 = vst [vmem:[%s1457_s2 + $0x118] sm:$0xff] %v618_v8 }
 0x136   :  { %668 = vst [vmem:[%s1457_s2 + $0x128] sm:$0xf] %v620_v59 }
 0x137   :  { %v473_v60 = vpop.f32.mrf.mxu2  ;;  %v522_v61 = vpop.f32.mrf.mxu3 }
 0x138   :  { %v619_v62 = vpack.c.bf16 %v522_v61, %v473_v60 }
 0x13a   :  { %v426_v63 = vpop.f32.mrf.mxu1  ;;  %v573_v0 = vpop.f32.mrf.mxu0  ;;  %667 = vst [vmem:[%s1457_s2 + $0x120] sm:$0xff] %v619_v62 }
 0x13b   :  { %v621_v11 = vpack.c.bf16 %v426_v63, %v1297_v15  ;;  %v623_v1 = vpack.c.bf16 %v573_v0, %v573_v0 }
 0x13d   :  { %669 = vst [vmem:[%s1457_s2 + $0x12c] sm:$0xff] %v621_v11 }
 0x13e   :  { %671 = vst [vmem:[%s1457_s2 + $0x13c] sm:$0xf] %v623_v1 }
 0x13f   :  { %v475_v2 = vpop.f32.mrf.mxu2  ;;  %v524_v3 = vpop.f32.mrf.mxu3 }
 0x140   :  { %v622_v28 = vpack.c.bf16 %v524_v3, %v475_v2 }
 0x142   :  { %670 = vst [vmem:[%s1457_s2 + $0x134] sm:$0xff] %v622_v28 }

// kernel: rgat_forward.5
= control target key start
LH: loop header
LB: loop body
LE: loop exit
PB: predicated region body
PF: predicated region fallthrough
CT: control target
= control target key end

     0   :  { %s1225_s18 = smov 0   ;;  %s1227_s19 = smov 0   ;;  %s1424_s0 = inlined_call_operand.vmem [shape: bf16[128,640], index: 0, kind: input, shape index: {}, may-alias: {0,1}]   ;;  %s1425_s1 = inlined_call_operand.vmem [shape: bf16[128,640], index: 1, kind: input, shape index: {}, may-alias: {0,1}]   ;;  %s1426_s2 = inlined_call_operand.vmem [shape: s8[4,128,128], index: 2, kind: input, shape index: {}]   ;;  %s1427_s3 = inlined_call_operand.vmem [shape: f32[4,128,1], index: 3, kind: input, shape index: {}]   ;;  %s1428_s4 = inlined_call_operand.vmem [shape: f32[1,128], index: 4, kind: input, shape index: {}]   ;;  %s1429_s5 = inlined_call_operand.vmem [shape: bf16[128,128], index: 5, kind: output, shape index: {}]  }
   0x1   :  { %s1229_s20 = smov 0  }
   0x2 LB: > { %s970_s21 = sadd.s32 4294967295, %s1192_s20   ;;  %s24_s22 = sadd.s32 1, %s1188_s19  ;;  %s1192_s20 = sphi %s1229_s20, %s15_s20   ;;  %s1188_s19 = sphi %s1227_s19, %s1432_s19   ;;  %s1184_s18 = sphi %s1225_s18, %s1431_s18  }
   0x3   : > { %p25_p0 = scmp.ge.s32.totalorder %s24_s22, 4  ;;  %p971_p1 = scmp.ge.s32.totalorder %s1192_s20, 1 }
   0x4   : > { %p182_p2 = scmp.lt.s32.totalorder %s1192_s20, 5 }
   0x5   : > { %s1434_s22 = smov (%p25_p0, %s24_s22), 0 }
   0x6   : > { %p1246_p3 = pnand %p971_p1, %p182_p2 }
   0x7   : > { %p972_p4 = scmp.ne.s32.totalorder (!%p1246_p3), %s970_s21, 0 }
   0x8   : > { %186 = sbr.rel (%p1246_p3) target bundleno = 35 (0x23), region = 12 }
   0xd   : > { %193 = sbr.rel (%p972_p4) target bundleno = 35 (0x23), region = 20 }
  0x12   : > { %v214_v0 = vld [vmem:[%s1425_s1] sm:$0xf]  ;;  %v216_v1 = vld [vmem:[%s1425_s1 + $0x14] sm:$0xf]  ;;  %v218_v2 = vld [vmem:[%s1425_s1 + $0x28] sm:$0xf] }
  0x13   : > { %215 = vst [vmem:[#allocation3] sm:$0xf] %v214_v0  ;;  %v220_v3 = vld [vmem:[%s1425_s1 + $0x3c] sm:$0xf]  ;;  %v222_v4 = vld [vmem:[%s1425_s1 + $0x50] sm:$0xf] }
  0x14   : > { %217 = vst [vmem:[#allocation3 + $0x4] sm:$0xf] %v216_v1  ;;  %v224_v5 = vld [vmem:[%s1425_s1 + $0x64] sm:$0xf]  ;;  %v226_v6 = vld [vmem:[%s1425_s1 + $0x78] sm:$0xf] }
  0x15   : > { %219 = vst [vmem:[#allocation3 + $0x8] sm:$0xf] %v218_v2  ;;  %v228_v7 = vld [vmem:[%s1425_s1 + $0x8c] sm:$0xf]  ;;  %v230_v8 = vld [vmem:[%s1425_s1 + $0xa0] sm:$0xf] }
  0x16   : > { %221 = vst [vmem:[#allocation3 + $0xc] sm:$0xf] %v220_v3  ;;  %v232_v9 = vld [vmem:[%s1425_s1 + $0xb4] sm:$0xf]  ;;  %v234_v10 = vld [vmem:[%s1425_s1 + $0xc8] sm:$0xf] }
  0x17   : > { %223 = vst [vmem:[#allocation3 + $0x10] sm:$0xf] %v222_v4  ;;  %v236_v11 = vld [vmem:[%s1425_s1 + $0xdc] sm:$0xf]  ;;  %v238_v12 = vld [vmem:[%s1425_s1 + $0xf0] sm:$0xf] }
  0x18   : > { %225 = vst [vmem:[#allocation3 + $0x14] sm:$0xf] %v224_v5  ;;  %v240_v13 = vld [vmem:[%s1425_s1 + $0x104] sm:$0xf]  ;;  %v242_v14 = vld [vmem:[%s1425_s1 + $0x118] sm:$0xf] }
  0x19   : > { %227 = vst [vmem:[#allocation3 + $0x18] sm:$0xf] %v226_v6  ;;  %v244_v15 = vld [vmem:[%s1425_s1 + $0x12c] sm:$0xf] }
  0x1a   : > { %229 = vst [vmem:[#allocation3 + $0x1c] sm:$0xf] %v228_v7 }
  0x1b   : > { %231 = vst [vmem:[#allocation3 + $0x20] sm:$0xf] %v230_v8 }
  0x1c   : > { %233 = vst [vmem:[#allocation3 + $0x24] sm:$0xf] %v232_v9 }
  0x1d   : > { %235 = vst [vmem:[#allocation3 + $0x28] sm:$0xf] %v234_v10 }
  0x1e   : > { %237 = vst [vmem:[#allocation3 + $0x2c] sm:$0xf] %v236_v11 }
  0x1f   : > { %239 = vst [vmem:[#allocation3 + $0x30] sm:$0xf] %v238_v12 }
  0x20   : > { %241 = vst [vmem:[#allocation3 + $0x34] sm:$0xf] %v240_v13 }
  0x21   : > { %243 = vst [vmem:[#allocation3 + $0x38] sm:$0xf] %v242_v14 }
  0x22   : > { %245 = vst [vmem:[#allocation3 + $0x3c] sm:$0xf] %v244_v15 }
  0x23 PF: > { %337 = sbr.rel (%p1246_p3) target bundleno = 282 (0x11a), region = 77  ;;  %p379_p5 = scmp.lt.s32.totalorder (!%p1246_p3), %s1184_s18, 3 }
  0x24   : > { %p979_p6 = scmp.ne.s32.totalorder (!%p1246_p3), %s1184_s18, 0 }
  0x28   : > { %s380_s11 = scalar_select %p379_p5, %s1184_s18, 3 }
  0x29   : > { %407 = sbr.rel (%p979_p6) target bundleno = 67 (0x43), region = 85 }
  0x2a   : > { %s1019_s12 = sshll.u32 %s380_s11, 5  ;;  %s1020_s13 = sshll.u32 %s380_s11, 7 }
  0x2b   : > { %s1307_s16 = scalar_lea.vmem %s1426_s2, %s1019_s12  ;;  %s1312_s24 = scalar_lea.vmem %s1427_s3, %s1020_s13 }
  0x2e   : > { %v1032_v16 = vld [vmem:[#allocation3] sm:$0xff]   ;;  %v1103_v20 = vld [vmem:[#allocation3 + $0x8] sm:$0xff]   ;;  %v1104_v21 = vld [vmem:[#allocation3 + $0x10] sm:$0xff]  }
  0x2f   : > { %v1166_v17 = vld [vmem:[%s1428_s4] ss:$0 sm:$0xff]  ;;  %v1033_v18 = vunpack.c.l.bf16 %v1032_v16  ;;  %v1034_v19 = vunpack.c.h.bf16 %v1032_v16  ;;  %v1105_v22 = vld [vmem:[#allocation3 + $0x18] sm:$0xff]   ;;  %v1037_v23 = vunpack.c.l.bf16 %v1103_v20  ;;  %v1038_v24 = vunpack.c.h.bf16 %v1103_v20  ;;  %v1107_v34 = vld [vmem:[#allocation3 + $0x28] sm:$0xff]  }
  0x30   : > { %v1041_v25 = vunpack.c.l.bf16 %v1104_v21  ;;  %v1042_v26 = vunpack.c.h.bf16 %v1104_v21  ;;  %v1106_v27 = vld [vmem:[#allocation3 + $0x20] sm:$0xff]   ;;  %v1045_v30 = vunpack.c.l.bf16 %v1105_v22  ;;  %v1046_v33 = vunpack.c.h.bf16 %v1105_v22  ;;  %v1108_v39 = vld [vmem:[#allocation3 + $0x30] sm:$0xff]   ;;  %v1109_v44 = vld [vmem:[#allocation3 + $0x38] sm:$0xff]  }
  0x31   : > { %v444_v28 = vadd.f32 %v1166_v17, %v1033_v18  ;;  %v445_v29 = vadd.f32 %v1166_v17, %v1034_v19  ;;  %v446_v31 = vadd.f32 %v1166_v17, %v1037_v23  ;;  %v447_v32 = vadd.f32 %v1166_v17, %v1038_v24 }
  0x32   : > { %v448_v35 = vadd.f32 %v1166_v17, %v1041_v25  ;;  %v1049_v36 = vunpack.c.l.bf16 %v1106_v27  ;;  %v449_v37 = vadd.f32 %v1166_v17, %v1042_v26  ;;  %v1050_v38 = vunpack.c.h.bf16 %v1106_v27 }
  0x33   : > { %460 = vst [vmem:[#allocation2 + $0x30] sm:$0xff] %v444_v28  ;;  %v450_v40 = vadd.f32 %v1166_v17, %v1045_v30  ;;  %v1053_v41 = vunpack.c.l.bf16 %v1107_v34  ;;  %v451_v42 = vadd.f32 %v1166_v17, %v1046_v33  ;;  %v1054_v43 = vunpack.c.h.bf16 %v1107_v34 }
  0x34   : > { %461 = vst [vmem:[#allocation2] sm:$0xff] %v445_v29  ;;  %v452_v45 = vadd.f32 %v1166_v17, %v1049_v36  ;;  %v1057_v46 = vunpack.c.l.bf16 %v1108_v39  ;;  %v453_v47 = vadd.f32 %v1166_v17, %v1050_v38  ;;  %v1058_v48 = vunpack.c.h.bf16 %v1108_v39 }
  0x35   : > { %462 = vst [vmem:[#allocation2 + $0x58] sm:$0xff] %v446_v31  ;;  %v454_v49 = vadd.f32 %v1166_v17, %v1053_v41  ;;  %v1061_v50 = vunpack.c.l.bf16 %v1109_v44  ;;  %v455_v51 = vadd.f32 %v1166_v17, %v1054_v43  ;;  %v1062_v52 = vunpack.c.h.bf16 %v1109_v44 }
  0x36   : > { %463 = vst [vmem:[#allocation2 + $0x18] sm:$0xff] %v447_v32  ;;  %v456_v53 = vadd.f32 %v1166_v17, %v1057_v46  ;;  %v457_v54 = vadd.f32 %v1166_v17, %v1058_v48 }
  0x37   : > { %464 = vst [vmem:[#allocation2 + $0x50] sm:$0xff] %v448_v35  ;;  %v458_v55 = vadd.f32 %v1166_v17, %v1061_v50  ;;  %v459_v56 = vadd.f32 %v1166_v17, %v1062_v52 }
  0x38   : > { %465 = vst [vmem:[#allocation2 + $0x68] sm:$0xff] %v449_v37 }
  0x39   : > { %466 = vst [vmem:[#allocation2 + $0x8] sm:$0xff] %v450_v40 }
  0x3a   : > { %467 = vst [vmem:[#allocation2 + $0x48] sm:$0xff] %v451_v42 }
  0x3b   : > { %468 = vst [vmem:[#allocation2 + $0x40] sm:$0xff] %v452_v45 }
  0x3c   : > { %469 = vst [vmem:[#allocation2 + $0x20] sm:$0xff] %v453_v47 }
  0x3d   : > { %470 = vst [vmem:[#allocation2 + $0x10] sm:$0xff] %v454_v49 }
  0x3e   : > { %471 = vst [vmem:[#allocation2 + $0x38] sm:$0xff] %v455_v51 }
  0x3f   : > { %472 = vst [vmem:[#allocation2 + $0x60] sm:$0xff] %v456_v53 }
  0x40   : > { %473 = vst [vmem:[#allocation2 + $0x70] sm:$0xff] %v457_v54 }
  0x41   : > { %474 = vst [vmem:[#allocation2 + $0x78] sm:$0xff] %v458_v55 }
  0x42   : > { %475 = vst [vmem:[#allocation2 + $0x28] sm:$0xff] %v459_v56 }
  0x43 PF: > { %v655_v57 = vld [vmem:[%s1312_s24] sm:$0xff]  ;;  %s1021_s26 = sshll.u32 %s1184_s18, 7  ;;  %v657_v58 = vld [vmem:[%s1312_s24 + $0x10] sm:$0xff]  ;;  %v1194_v59 = vmov 0   ;;  %v656_v1 = vld [vmem:[%s1312_s24 + $0x8] sm:$0xff]  ;;  %p1014_p7 = scmp.ne.s32.totalorder %s1184_s18, 3 }
  0x44   : > { %1167 = vset.pattern.permute.xlu0 %v1194_v59  ;;  %s1022_s27 = sadd.s32 128, %s1021_s26  ;;  %1168 = vset.pattern.permute.xlu1 %v1194_v59  ;;  %v658_v2 = vld [vmem:[%s1312_s24 + $0x18] sm:$0xff]  ;;  %v659_v6 = vld [vmem:[%s1312_s24 + $0x20] sm:$0xff]  ;;  %v661_v10 = vld [vmem:[%s1312_s24 + $0x30] sm:$0xff] }
  0x45   : > { %673 = vperm.xlu0 %1167, %v655_v57   ;;  %s478_s28 = sshra.s32 %s1022_s27, 7  ;;  %683 = vperm.xlu1 %1168, %v657_v58   ;;  %v662_v11 = vld [vmem:[%s1312_s24 + $0x38] sm:$0xff]  ;;  %v660_v13 = vld [vmem:[%s1312_s24 + $0x28] sm:$0xff]  ;;  %v1346_v20 = vld [vmem:[%s1307_s16] sm:$0xff] }
  0x46   : > { %s981_s29 = sshll.u32 %s478_s28, 2  ;;  %1169 = vset.pattern.permute.xlu2 %v1194_v59  ;;  %v664_v19 = vld [vmem:[%s1312_s24 + $0x48] sm:$0xff]  ;;  %v665_v21 = vld [vmem:[%s1312_s24 + $0x50] sm:$0xff]  ;;  %v663_v25 = vld [vmem:[%s1312_s24 + $0x40] sm:$0xff]  ;;  %v502_v29 = vunpack.c.0.s8 %v1346_v20  ;;  %v503_v30 = vunpack.c.1.s8 %v1346_v20  ;;  %v504_v58 = vunpack.c.2.s8 %v1346_v20  ;;  %v505_v59 = vunpack.c.3.s8 %v1346_v20 }
  0x47   : > { %s1324_s7 = scalar_lea.vmem %s1424_s0, %s981_s29  ;;  %693 = vperm.xlu2 %1169, %v659_v6   ;;  %v1350_v23 = vld [vmem:[%s1307_s16 + $0x8] sm:$0xff]  ;;  %v1353_v24 = vld [vmem:[%s1307_s16 + $0x10] sm:$0xff]  ;;  %v1359_v28 = vld [vmem:[%s1307_s16 + $0x18] sm:$0xff] }
  0x48   : > { %v1012_v60 = vld [vmem:[%s1324_s7 + $0x118] sm:$0xf]  ;;  %v1030_v61 = vld [vmem:[%s1324_s7 + $0x128] sm:$0xf0]  ;;  %v1008_v62 = vld [vmem:[%s1324_s7 + $0xf0] sm:$0xf]  ;;  %v506_v31 = vunpack.c.0.s8 %v1350_v23  ;;  %v507_v32 = vunpack.c.1.s8 %v1350_v23  ;;  %v510_v33 = vunpack.c.0.s8 %v1353_v24  ;;  %v511_v35 = vunpack.c.1.s8 %v1353_v24 }
  0x49   : > { %v1013_v63 = vor.u32 %v1030_v61, %v1012_v60  ;;  %v1029_v0 = vld [vmem:[%s1324_s7 + $0x100] sm:$0xf0]  ;;  %v1004_v4 = vld [vmem:[%s1324_s7 + $0xc8] sm:$0xf]  ;;  %v1028_v5 = vld [vmem:[%s1324_s7 + $0xd8] sm:$0xf0]  ;;  %v514_v36 = vunpack.c.0.s8 %v1359_v28  ;;  %v515_v37 = vunpack.c.1.s8 %v1359_v28  ;;  %v518_v40 = vcvt.s32.f32 %v502_v29 }
  0x4a   : > { %v1009_v3 = vor.u32 %v1029_v0, %v1008_v62  ;;  %v1005_v7 = vor.u32 %v1028_v5, %v1004_v4  ;;  %v1000_v8 = vld [vmem:[%s1324_s7 + $0xa0] sm:$0xf]  ;;  %v1027_v9 = vld [vmem:[%s1324_s7 + $0xb0] sm:$0xf0]  ;;  %v996_v14 = vld [vmem:[%s1324_s7 + $0x78] sm:$0xf]  ;;  %v519_v42 = vcvt.s32.f32 %v503_v30  ;;  %v522_v43 = vcvt.s32.f32 %v506_v31 }
  0x4b   : > { %590 = vmatpush.bf16.msra.mxu0 %v1013_v63  ;;  %1117 = vmatpush.bf16.msra.mxu1 %v1013_v63  ;;  %v1001_v12 = vor.u32 %v1027_v9, %v1000_v8  ;;  %v1026_v15 = vld [vmem:[%s1324_s7 + $0x88] sm:$0xf0]  ;;  %v992_v17 = vld [vmem:[%s1324_s7 + $0x50] sm:$0xf]  ;;  %v1025_v18 = vld [vmem:[%s1324_s7 + $0x60] sm:$0xf0]  ;;  %v523_v44 = vcvt.s32.f32 %v507_v32  ;;  %v526_v45 = vcvt.s32.f32 %v510_v33  ;;  %v527_v48 = vcvt.s32.f32 %v511_v35 }
  0x4c   : > { %1118 = vmatpush.bf16.msra.mxu2 %v1013_v63  ;;  %1119 = vmatpush.bf16.msra.mxu3 %v1013_v63  ;;  %v997_v16 = vor.u32 %v1026_v15, %v996_v14  ;;  %v993_v22 = vor.u32 %v1025_v18, %v992_v17  ;;  %v988_v26 = vld [vmem:[%s1324_s7 + $0x28] sm:$0xf]  ;;  %v1024_v27 = vld [vmem:[%s1324_s7 + $0x38] sm:$0xf0]  ;;  %v984_v38 = vld [vmem:[%s1324_s7] sm:$0xf]  ;;  %v530_v49 = vcvt.s32.f32 %v514_v36  ;;  %v531_v50 = vcvt.s32.f32 %v515_v37 }
  0x4d   : > { %678 = vperm.xlu0 %1167, %v656_v1   ;;  %688 = vperm.xlu1 %1168, %v658_v2   ;;  %v989_v34 = vor.u32 %v1024_v27, %v988_v26  ;;  %v1023_v39 = vld [vmem:[%s1324_s7 + $0x10] sm:$0xf0]  ;;  %v667_v41 = vld [vmem:[%s1312_s24 + $0x60] sm:$0xff]  ;;  %v668_v46 = vld [vmem:[%s1312_s24 + $0x68] sm:$0xff]  ;;  %v534_v52 = vpack.c.bf16 %v519_v42, %v518_v40  ;;  %v536_v53 = vpack.c.bf16 %v523_v44, %v522_v43  ;;  %v508_v60 = vunpack.c.2.s8 %v1350_v23 }
  0x4e   : > { %v985_v47 = vor.u32 %v1023_v39, %v984_v38  ;;  %v666_v51 = vld [vmem:[%s1312_s24 + $0x58] sm:$0xff]  ;;  %v538_v54 = vpack.c.bf16 %v527_v48, %v526_v45  ;;  %v540_v55 = vpack.c.bf16 %v531_v50, %v530_v49  ;;  %v669_v57 = vld [vmem:[%s1312_s24 + $0x70] sm:$0xff]  ;;  %v509_v61 = vunpack.c.3.s8 %v1350_v23  ;;  %v647_v35 = vld [vmem:[#allocation2 + $0x40] sm:$0xff] }
  0x4f   : > { %591 = vmatpush.bf16.msra.mxu0 %v1009_v3  ;;  %1120 = vmatpush.bf16.msra.mxu1 %v1009_v3  ;;  %v670_v56 = vld [vmem:[%s1312_s24 + $0x78] sm:$0xff]  ;;  %v512_v62 = vunpack.c.2.s8 %v1353_v24  ;;  %v513_v63 = vunpack.c.3.s8 %v1353_v24  ;;  %v516_v0 = vunpack.c.2.s8 %v1359_v28  ;;  %v517_v1 = vunpack.c.3.s8 %v1359_v28  ;;  %v639_v24 = vld [vmem:[#allocation2 + $0x30] sm:$0xff]  ;;  %v651_v37 = vld [vmem:[#allocation2 + $0x60] sm:$0xff] }
  0x50   : > { %1121 = vmatpush.bf16.msra.mxu2 %v1009_v3  ;;  %1122 = vmatpush.bf16.msra.mxu3 %v1009_v3  ;;  %v520_v2 = vcvt.s32.f32 %v504_v58  ;;  %v521_v3 = vcvt.s32.f32 %v505_v59  ;;  %v524_v4 = vcvt.s32.f32 %v508_v60  ;;  %v525_v5 = vcvt.s32.f32 %v509_v61  ;;  %v643_v26 = vld [vmem:[#allocation2 + $0x50] sm:$0xff]  ;;  %v644_v43 = vld [vmem:[#allocation2 + $0x68] sm:$0xff]  ;;  %v641_v59 = vld [vmem:[#allocation2 + $0x58] sm:$0xff] }
  0x51   : > { %698 = vperm.xlu2 %1169, %v660_v13   ;;  %v528_v6 = vcvt.s32.f32 %v512_v62  ;;  %v532_v8 = vcvt.s32.f32 %v516_v0  ;;  %v533_v9 = vcvt.s32.f32 %v517_v1  ;;  %v645_v61 = vld [vmem:[#allocation2 + $0x8] sm:$0xff] }
  0x53   : > { %592 = vmatpush.bf16.msra.mxu0 %v1005_v7  ;;  %1123 = vmatpush.bf16.msra.mxu1 %v1005_v7  ;;  %v541_v13 = vpack.c.bf16 %v533_v9, %v532_v8  ;;  %v653_v8 = vld [vmem:[#allocation2 + $0x78] sm:$0xff] }
  0x54   : > { %1124 = vmatpush.bf16.msra.mxu2 %v1005_v7  ;;  %1125 = vmatpush.bf16.msra.mxu3 %v1005_v7  ;;  %v529_v7 = vcvt.s32.f32 %v513_v63 }
  0x55   : > { %703 = vperm.xlu0 %1167, %v661_v10   ;;  %708 = vperm.xlu1 %1168, %v662_v11   ;;  %v535_v10 = vpack.c.bf16 %v521_v3, %v520_v2  ;;  %v537_v11 = vpack.c.bf16 %v525_v5, %v524_v4 }
  0x57   : > { %593 = vmatpush.bf16.msra.mxu0 %v1001_v12  ;;  %1126 = vmatpush.bf16.msra.mxu1 %v1001_v12 }
  0x58   : > { %1127 = vmatpush.bf16.msra.mxu2 %v1001_v12  ;;  %1128 = vmatpush.bf16.msra.mxu3 %v1001_v12  ;;  %v539_v12 = vpack.c.bf16 %v529_v7, %v528_v6  ;;  %v649_v6 = vld [vmem:[#allocation2 + $0x10] sm:$0xff] }
  0x59   : > { %713 = vperm.xlu2 %1169, %v663_v25  }
  0x5b   : > { %594 = vmatpush.bf16.msra.mxu0 %v997_v16  ;;  %1129 = vmatpush.bf16.msra.mxu1 %v997_v16 }
  0x5c   : > { %1130 = vmatpush.bf16.msra.mxu2 %v997_v16  ;;  %1131 = vmatpush.bf16.msra.mxu3 %v997_v16 }
  0x5d   : > { %718 = vperm.xlu0 %1167, %v664_v19   ;;  %723 = vperm.xlu1 %1168, %v665_v21  }
  0x5f   : > { %595 = vmatpush.bf16.msra.mxu0 %v993_v22  ;;  %1132 = vmatpush.bf16.msra.mxu1 %v993_v22 }
  0x60   : > { %1133 = vmatpush.bf16.msra.mxu2 %v993_v22  ;;  %1134 = vmatpush.bf16.msra.mxu3 %v993_v22 }
  0x61   : > { %728 = vperm.xlu2 %1169, %v666_v51  }
  0x63   : > { %596 = vmatpush.bf16.msra.mxu0 %v989_v34  ;;  %1135 = vmatpush.bf16.msra.mxu1 %v989_v34 }
  0x64   : > { %1136 = vmatpush.bf16.msra.mxu2 %v989_v34  ;;  %1137 = vmatpush.bf16.msra.mxu3 %v989_v34 }
  0x65   : > { %733 = vperm.xlu0 %1167, %v667_v41   ;;  %738 = vperm.xlu1 %1168, %v668_v46   ;;  %v640_v41 = vld [vmem:[#allocation2] sm:$0xff] }
  0x67   : > { %597 = vmatpush.bf16.msra.mxu0 %v985_v47  ;;  %1138 = vmatpush.bf16.msra.mxu1 %v985_v47 }
  0x68   : > { %1139 = vmatpush.bf16.msra.mxu2 %v985_v47  ;;  %1140 = vmatpush.bf16.msra.mxu3 %v985_v47 }
  0x69   : > { %743 = vperm.xlu2 %1169, %v669_v57  }
  0x6a   : > { %598 = vmatmul.bf16.vlgmr.msra.gmra.mxu0 %v534_v52  ;;  %608 = vmatmul.bf16.vlgmr.msra.gmra.mxu1 %v536_v53  ;;  %v648_v53 = vld [vmem:[#allocation2 + $0x20] sm:$0xff] }
  0x6b   : > { %618 = vmatmul.bf16.vlgmr.msra.gmra.mxu2 %v538_v54  ;;  %628 = vmatmul.bf16.vlgmr.msra.gmra.mxu3 %v540_v55  ;;  %v652_v55 = vld [vmem:[#allocation2 + $0x70] sm:$0xff] }
  0x6d   : > { %748 = vperm.xlu0 %1167, %v670_v56  }
  0x7a   : > { %603 = vmatmul.bf16.gmra.mxu0 %v535_v10  ;;  %613 = vmatmul.bf16.gmra.mxu1 %v537_v11 }
  0x7b   : > { %623 = vmatmul.bf16.gmra.mxu2 %v539_v12  ;;  %633 = vmatmul.bf16.gmra.mxu3 %v541_v13  ;;  %v642_v12 = vld [vmem:[#allocation2 + $0x18] sm:$0xff] }
  0xa1   : > { %v694_v17 = vpop.permute.xlu2 %693 }
  0xab   : > { %v699_v20 = vpop.permute.xlu2 %698 }
  0xb3   : > { %v714_v29 = vpop.permute.xlu2 %713 }
  0xb7   : > { %v674_v14 = vpop.permute.xlu0 %673  ;;  %v684_v15 = vpop.permute.xlu1 %683 }
  0xbb   : > { %v729_v50 = vpop.permute.xlu2 %728 }
  0xbf   : > { %v679_v16 = vpop.permute.xlu0 %678  ;;  %v1384_v18 = vpop.permute.xlu1 %688 }
  0xc3   : > { %v744_v4 = vpop.permute.xlu2 %743 }
  0xc7   : > { %v704_v19 = vpop.permute.xlu0 %703  ;;  %v1386_v21 = vpop.permute.xlu1 %708 }
  0xcf   : > { %v719_v22 = vpop.permute.xlu0 %718  ;;  %v724_v32 = vpop.permute.xlu1 %723 }
  0xd7   : > { %v734_v33 = vpop.permute.xlu0 %733  ;;  %v739_v51 = vpop.permute.xlu1 %738 }
  0xe7   : > { %v599_v23 = vpop.f32.mrf.mxu0  ;;  %v609_v25 = vpop.f32.mrf.mxu1 }
  0xe8   : > { %v751_v27 = vmul.f32 %v674_v14, %v599_v23  ;;  %v755_v28 = vmul.f32 %v694_v17, %v609_v25  ;;  %v646_v14 = vld [vmem:[#allocation2 + $0x48] sm:$0xff]  ;;  %v749_v23 = vpop.permute.xlu0 %748  ;;  %v650_v25 = vld [vmem:[#allocation2 + $0x38] sm:$0xff] }
  0xea   : > { %v767_v30 = vadd.f32 %v751_v27, %v639_v24  ;;  %v771_v31 = vadd.f32 %v755_v28, %v643_v26  ;;  %v654_v27 = vld [vmem:[#allocation2 + $0x28] sm:$0xff] }
  0xec   : > { %783 = vst [vmem:[#allocation2 + $0x30] sm:$0xff] %v767_v30 }
  0xed   : > { %787 = vst [vmem:[#allocation2 + $0x50] sm:$0xff] %v771_v31 }
  0xee   : > { %v619_v34 = vpop.f32.mrf.mxu2  ;;  %v629_v36 = vpop.f32.mrf.mxu3 }
  0xef   : > { %v759_v38 = vmul.f32 %v714_v29, %v619_v34  ;;  %v763_v39 = vmul.f32 %v734_v33, %v629_v36  ;;  %v601_v40 = vpop.f32.mrf.mxu0  ;;  %v611_v42 = vpop.f32.mrf.mxu1 }
  0xf0   : > { %v752_v44 = vmul.f32 %v679_v16, %v601_v40  ;;  %v756_v45 = vmul.f32 %v699_v20, %v611_v42 }
  0xf1   : > { %v775_v46 = vadd.f32 %v759_v38, %v647_v35  ;;  %v779_v47 = vadd.f32 %v763_v39, %v651_v37 }
  0xf2   : > { %v768_v48 = vadd.f32 %v752_v44, %v640_v41  ;;  %v772_v49 = vadd.f32 %v756_v45, %v644_v43 }
  0xf3   : > { %791 = vst [vmem:[#allocation2 + $0x40] sm:$0xff] %v775_v46 }
  0xf4   : > { %795 = vst [vmem:[#allocation2 + $0x60] sm:$0xff] %v779_v47 }
  0xf5   : > { %784 = vst [vmem:[#allocation2] sm:$0xff] %v768_v48 }
  0xf6   : > { %788 = vst [vmem:[#allocation2 + $0x68] sm:$0xff] %v772_v49  ;;  %v621_v52 = vpop.f32.mrf.mxu2  ;;  %v631_v54 = vpop.f32.mrf.mxu3 }
  0xf7   : > { %v760_v56 = vmul.f32 %v719_v22, %v621_v52  ;;  %v764_v57 = vmul.f32 %v739_v51, %v631_v54  ;;  %v604_v58 = vpop.f32.mrf.mxu0  ;;  %v614_v60 = vpop.f32.mrf.mxu1 }
  0xf8   : > { %v753_v62 = vmul.f32 %v684_v15, %v604_v58  ;;  %v757_v63 = vmul.f32 %v704_v19, %v614_v60 }
  0xf9   : > { %v776_v0 = vadd.f32 %v760_v56, %v648_v53  ;;  %v780_v1 = vadd.f32 %v764_v57, %v652_v55 }
  0xfa   : > { %v769_v2 = vadd.f32 %v753_v62, %v641_v59  ;;  %v773_v3 = vadd.f32 %v757_v63, %v645_v61 }
  0xfb   : > { %792 = vst [vmem:[#allocation2 + $0x20] sm:$0xff] %v776_v0 }
  0xfc   : > { %796 = vst [vmem:[#allocation2 + $0x70] sm:$0xff] %v780_v1 }
  0xfd   : > { %785 = vst [vmem:[#allocation2 + $0x58] sm:$0xff] %v769_v2 }
  0xfe   : > { %789 = vst [vmem:[#allocation2 + $0x8] sm:$0xff] %v773_v3  ;;  %v624_v5 = vpop.f32.mrf.mxu2  ;;  %v634_v7 = vpop.f32.mrf.mxu3 }
  0xff   : > { %v761_v9 = vmul.f32 %v724_v32, %v624_v5  ;;  %v765_v10 = vmul.f32 %v744_v4, %v634_v7  ;;  %v606_v11 = vpop.f32.mrf.mxu0  ;;  %v616_v13 = vpop.f32.mrf.mxu1 }
 0x100   : > { %v754_v15 = vmul.f32 %v1384_v18, %v606_v11  ;;  %v758_v16 = vmul.f32 %v1386_v21, %v616_v13 }
 0x101   : > { %v777_v17 = vadd.f32 %v761_v9, %v649_v6  ;;  %v781_v19 = vadd.f32 %v765_v10, %v653_v8 }
 0x102   : > { %v770_v20 = vadd.f32 %v754_v15, %v642_v12  ;;  %v774_v22 = vadd.f32 %v758_v16, %v646_v14 }
 0x103   : > { %793 = vst [vmem:[#allocation2 + $0x10] sm:$0xff] %v777_v17 }
 0x104   : > { %797 = vst [vmem:[#allocation2 + $0x78] sm:$0xff] %v781_v19 }
 0x105   : > { %786 = vst [vmem:[#allocation2 + $0x18] sm:$0xff] %v770_v20 }
 0x106   : > { %790 = vst [vmem:[#allocation2 + $0x48] sm:$0xff] %v774_v22  ;;  %v626_v24 = vpop.f32.mrf.mxu2  ;;  %v636_v26 = vpop.f32.mrf.mxu3 }
 0x107   : > { %v762_v28 = vmul.f32 %v729_v50, %v626_v24  ;;  %v766_v29 = vmul.f32 %v749_v23, %v636_v26 }
 0x108   : > { %802 = sbr.rel (%p1014_p7) target bundleno = 282 (0x11a), region = 89 }
 0x109   : > { %v778_v30 = vadd.f32 %v762_v28, %v650_v25  ;;  %v782_v31 = vadd.f32 %v766_v29, %v654_v27 }
 0x10b   : > { %794 = vst [vmem:[#allocation2 + $0x38] sm:$0xff] %v778_v30 }
 0x10c   : > { %798 = vst [vmem:[#allocation2 + $0x28] sm:$0xff] %v782_v31 }
 0x10d   : > { %v803_v18 = vld [vmem:[#allocation2 + $0x30] sm:$0xff]  ;;  %v804_v21 = vld [vmem:[#allocation2] sm:$0xff]  ;;  %v805_v32 = vld [vmem:[#allocation2 + $0x58] sm:$0xff] }
 0x10e   : > { %v819_v33 = vmax.f32 %v803_v18, 0.0  ;;  %v820_v34 = vmax.f32 %v804_v21, 0.0  ;;  %v806_v35 = vld [vmem:[#allocation2 + $0x18] sm:$0xff]  ;;  %v821_v36 = vmax.f32 %v805_v32, 0.0  ;;  %v807_v37 = vld [vmem:[#allocation2 + $0x50] sm:$0xff]  ;;  %v808_v38 = vld [vmem:[#allocation2 + $0x68] sm:$0xff] }
 0x10f   : > { %v822_v39 = vmax.f32 %v806_v35, 0.0  ;;  %v823_v40 = vmax.f32 %v807_v37, 0.0  ;;  %v824_v41 = vmax.f32 %v808_v38, 0.0  ;;  %v809_v42 = vld [vmem:[#allocation2 + $0x8] sm:$0xff]  ;;  %v811_v44 = vld [vmem:[#allocation2 + $0x40] sm:$0xff]  ;;  %v813_v50 = vld [vmem:[#allocation2 + $0x10] sm:$0xff] }
 0x110   : > { %v810_v43 = vld [vmem:[#allocation2 + $0x48] sm:$0xff]  ;;  %v1066_v45 = vpack.c.bf16 %v820_v34, %v819_v33  ;;  %v825_v46 = vmax.f32 %v809_v42, 0.0  ;;  %v812_v48 = vld [vmem:[#allocation2 + $0x20] sm:$0xff]  ;;  %v827_v49 = vmax.f32 %v811_v44, 0.0  ;;  %v829_v55 = vmax.f32 %v813_v50, 0.0  ;;  %v816_v57 = vld [vmem:[#allocation2 + $0x70] sm:$0xff] }
 0x111   : > { %v826_v47 = vmax.f32 %v810_v43, 0.0  ;;  %v1071_v52 = vpack.c.bf16 %v822_v39, %v821_v36  ;;  %v1076_v53 = vpack.c.bf16 %v824_v41, %v823_v40  ;;  %v828_v54 = vmax.f32 %v812_v48, 0.0  ;;  %v815_v56 = vld [vmem:[#allocation2 + $0x60] sm:$0xff]  ;;  %v817_v58 = vld [vmem:[#allocation2 + $0x78] sm:$0xff] }
 0x112   : > { %v814_v51 = vld [vmem:[#allocation2 + $0x38] sm:$0xff]  ;;  %1067 = vst [vmem:[%s1429_s5] sm:$0xff] %v1066_v45   ;;  %v831_v61 = vmax.f32 %v815_v56, 0.0  ;;  %v832_v62 = vmax.f32 %v816_v57, 0.0  ;;  %v833_v1 = vmax.f32 %v817_v58, 0.0 }
 0x113   : > { %v1081_v59 = vpack.c.bf16 %v826_v47, %v825_v46  ;;  %v830_v60 = vmax.f32 %v814_v51, 0.0  ;;  %v818_v63 = vld [vmem:[#allocation2 + $0x28] sm:$0xff]  ;;  %1110 = vst [vmem:[%s1429_s5 + $0x8] sm:$0xff] %v1071_v52   ;;  %v1086_v0 = vpack.c.bf16 %v828_v54, %v827_v49 }
 0x114   : > { %v834_v2 = vmax.f32 %v818_v63, 0.0  ;;  %1111 = vst [vmem:[%s1429_s5 + $0x10] sm:$0xff] %v1076_v53   ;;  %v1096_v4 = vpack.c.bf16 %v832_v62, %v831_v61 }
 0x115   : > { %v1091_v3 = vpack.c.bf16 %v830_v60, %v829_v55  ;;  %1112 = vst [vmem:[%s1429_s5 + $0x18] sm:$0xff] %v1081_v59  }
 0x116   : > { %v1101_v5 = vpack.c.bf16 %v834_v2, %v833_v1  ;;  %1113 = vst [vmem:[%s1429_s5 + $0x20] sm:$0xff] %v1086_v0  }
 0x117   : > { %1114 = vst [vmem:[%s1429_s5 + $0x28] sm:$0xff] %v1091_v3  }
 0x118   : > { %1115 = vst [vmem:[%s1429_s5 + $0x30] sm:$0xff] %v1096_v4  }
 0x119   : > { %1116 = vst [vmem:[%s1429_s5 + $0x38] sm:$0xff] %v1101_v5  }
 0x11a PF: > { %s15_s20 = sadd.s32 1, %s1192_s20   ;;  %s1431_s18 = smov %s1188_s19 }
 0x11b   : > { %p12_p8 = scmp.ge.s32.totalorder %s15_s20, 6   ;;  %s1432_s19 = smov %s1434_s22 }
 0x11d   :  { %14 = sbr.rel (!%p12_p8) target bundleno = 2 (0x2), region = 128 }

</bundles_post_ra>
